<compile_context>
chip_gen: v5e
topology: v5e:2x2
jax: 0.10.0
libtpu: 0.0.40
codegen_flags: <defaults>
</compile_context>

<pallas_src>
import math

import jax
import jax.numpy as jnp
from jax.experimental import pallas as pl
from jax.experimental.pallas import tpu as pltpu

_MIB = 1024 * 1024


# --------------------------------------------------------------------------
# VMEM budgeting (generation-aware)
# --------------------------------------------------------------------------
def _vmem_budget():
    """Returns (vmem_limit_bytes, block_budget_bytes).

    vmem_limit_bytes is passed to pltpu.CompilerParams (raises the default
    16/32 MiB scoped limit, leaving headroom for Mosaic internal scratch).
    block_budget_bytes is the budget for auto-pipelined block buffers
    (2x input + 2x output double buffering) in a single grid step.
    """
    try:
        cap = int(pltpu.get_tpu_info().vmem_capacity_bytes)
    except Exception:
        cap = 64 * _MIB  # conservative: v7x per-TensorCore VMEM
    vmem_limit = max(min(cap - 16 * _MIB, 100 * _MIB), 32 * _MIB)
    block_budget = vmem_limit - 4 * _MIB  # headroom for weights / scratch
    return vmem_limit, block_budget


def _choose_spatial_tile(S, max_st):
    """Largest lane-aligned (multiple of 128) divisor of S that is <= max_st."""
    if S <= max_st:
        return S
    d = (min(max_st, S) // 128) * 128
    while d >= 128:
        if S % d == 0:
            return d
        d -= 128
    return -1


# --------------------------------------------------------------------------
# Kernels
# --------------------------------------------------------------------------
def _ca_fused_kernel(x_ref, w1t_ref, b1_ref, w2t_ref, b2_ref, o_ref):
    # x_ref block: (Bt, C, S) with the spatial axis (lane-dense) last.
    x = x_ref[...]
    inv_s = jnp.float32(1.0 / x.shape[-1])

    # Global average pool over the spatial (lane) axis, accumulated in f32.
    y = jnp.sum(x.astype(jnp.float32), axis=-1) * inv_s          # (Bt, C)

    # Squeeze: (Bt, C) @ (C, C_sq) + bias, ReLU.   (tiny, hidden under DMA)
    h = jnp.dot(y, w1t_ref[...], preferred_element_type=jnp.float32) + b1_ref[...]
    h = jnp.maximum(h, 0.0)                                       # (Bt, C_sq)

    # Excite: (Bt, C_sq) @ (C_sq, C) + bias, exact sigmoid (EUP exp).
    z = jnp.dot(h, w2t_ref[...], preferred_element_type=jnp.float32) + b2_ref[...]
    s = 1.0 / (1.0 + jnp.exp(-z))                                 # (Bt, C) f32

    # Rescale: broadcast per-(batch, channel) scale across lanes; the big
    # multiply and the store stay in the I/O dtype (bf16-friendly).
    o_ref[...] = (x * s[:, :, None].astype(x.dtype)).astype(o_ref.dtype)


def _pool_kernel(x_ref, sum_ref):
    # Fallback pass 1: accumulate per-(batch, channel) spatial sums in f32.
    @pl.when(pl.program_id(1) == 0)
    def _():
        sum_ref[...] = jnp.zeros_like(sum_ref)

    sum_ref[...] += jnp.sum(x_ref[...].astype(jnp.float32), axis=-1,
                            keepdims=True)


def _rescale_kernel(x_ref, s_ref, o_ref):
    # Fallback pass 2: x * s with s broadcast over the spatial (lane) axis.
    x = x_ref[...]
    o_ref[...] = (x * s_ref[...].astype(x.dtype)).astype(o_ref.dtype)


# --------------------------------------------------------------------------
# pallas_call wrappers
# --------------------------------------------------------------------------
def _fused_call(x3, w1t, b1r, w2t, b2r, bt, vmem_limit, donate):
    B, C, S = x3.shape
    itemsize = jnp.dtype(x3.dtype).itemsize
    cost = pl.CostEstimate(
        flops=2 * B * C * S,            # pool adds + rescale muls
        transcendentals=B * C,          # sigmoid exp
        bytes_accessed=2 * B * C * S * itemsize)

    return pl.pallas_call(
        _ca_fused_kernel,
        out_shape=jax.ShapeDtypeStruct((B, C, S), x3.dtype),
        grid_spec=pltpu.PrefetchScalarGridSpec(
            num_scalar_prefetch=0,
            grid=(B // bt,),
            in_specs=[
                pl.BlockSpec((bt, C, S), lambda i: (i, 0, 0)),
                pl.BlockSpec(w1t.shape, lambda i: (0, 0)),
                pl.BlockSpec(b1r.shape, lambda i: (0, 0)),
                pl.BlockSpec(w2t.shape, lambda i: (0, 0)),
                pl.BlockSpec(b2r.shape, lambda i: (0, 0)),
            ],
            out_specs=pl.BlockSpec((bt, C, S), lambda i: (i, 0, 0)),
        ),
        compiler_params=pltpu.CompilerParams(
            dimension_semantics=("parallel",),
            vmem_limit_bytes=vmem_limit),
        cost_estimate=cost,
        input_output_aliases=({0: 0} if donate else {}),
    )(x3, w1t, b1r, w2t, b2r)


def _two_pass_call(x3, w1, b1, w2, b2, st, vmem_limit):
    B, C, S = x3.shape
    itemsize = jnp.dtype(x3.dtype).itemsize
    n_t = S // st

    # Pass 1: spatial sums (f32 accumulator resident across the tile axis).
    sums = pl.pallas_call(
        _pool_kernel,
        out_shape=jax.ShapeDtypeStruct((B, C, 1), jnp.float32),
        grid_spec=pltpu.PrefetchScalarGridSpec(
            num_scalar_prefetch=0,
            grid=(B, n_t),
            in_specs=[pl.BlockSpec((1, C, st), lambda b, t: (b, 0, t))],
            out_specs=pl.BlockSpec((1, C, 1), lambda b, t: (b, 0, 0)),
        ),
        compiler_params=pltpu.CompilerParams(
            dimension_semantics=("parallel", "arbitrary"),
            vmem_limit_bytes=vmem_limit),
        cost_estimate=pl.CostEstimate(
            flops=B * C * S, transcendentals=0,
            bytes_accessed=B * C * S * itemsize),
    )(x3)

    # Tiny excitation path in plain JAX (a few hundred FLOPs, f32).
    y = sums[:, :, 0] / jnp.float32(S)                         # (B, C)
    h = jnp.maximum(y @ w1.T + b1, 0.0)                        # (B, C_sq)
    z = h @ w2.T + b2                                          # (B, C)
    s3 = (1.0 / (1.0 + jnp.exp(-z)))[:, :, None]               # (B, C, 1) f32

    # Pass 2: lane-dense spatially-tiled rescale.
    out = pl.pallas_call(
        _rescale_kernel,
        out_shape=jax.ShapeDtypeStruct((B, C, S), x3.dtype),
        grid_spec=pltpu.PrefetchScalarGridSpec(
            num_scalar_prefetch=0,
            grid=(B, n_t),
            in_specs=[
                pl.BlockSpec((1, C, st), lambda b, t: (b, 0, t)),
                pl.BlockSpec((1, C, 1), lambda b, t: (b, 0, 0)),
            ],
            out_specs=pl.BlockSpec((1, C, st), lambda b, t: (b, 0, t)),
        ),
        compiler_params=pltpu.CompilerParams(
            dimension_semantics=("parallel", "parallel"),
            vmem_limit_bytes=vmem_limit),
        cost_estimate=pl.CostEstimate(
            flops=B * C * S, transcendentals=0,
            bytes_accessed=2 * B * C * S * itemsize),
    )(x3, s3)
    return out


def channel_attention_pallas(x, w1, b1, w2, b2, *, donate=False,
                             max_block_bytes=None):
    """x: (B, C, D, H, W) float (f32 or bf16).
    w1: (C//sq, C), b1: (C//sq,), w2: (C, C//sq), b2: (C,)  (Conv3d 1x1x1)."""
    B, C, D, H, W = x.shape
    S = D * H * W
    x3 = x.reshape(B, C, S)
    itemsize = jnp.dtype(x.dtype).itemsize
    # Extra bytes/elem for the in-kernel f32 pooling temporary when x is not f32.
    cast_extra = 0 if x.dtype == jnp.float32 else 4

    vmem_limit, block_budget = _vmem_budget()
    if max_block_bytes is not None:           # (test hook / manual override)
        block_budget = min(block_budget, max_block_bytes)

    # Fused single-pass path: largest batch tile whose 2x-in + 2x-out buffers
    # fit the budget while keeping >= 2 "parallel" grid steps (v7x megacore).
    per_batch_bytes = C * S * (4 * itemsize + cast_extra)
    bt = 0
    for cand in range(min(B, 8), 0, -1):
        if B % cand:
            continue
        if B >= 2 and (B // cand) < 2:
            continue
        if cand * per_batch_bytes <= block_budget:
            bt = cand
            break

    if bt > 0:
        # TODO(synk): for B == 1 on v7x, a spatially-split rescale would let
        # both TensorCores share the mem-bound work; single-step fused is used
        # here whenever it fits.
        out = _fused_call(x3, w1.T, b1.reshape(1, -1), w2.T, b2.reshape(1, -1),
                          bt, vmem_limit, donate)
    else:
        # Two-pass spatially-tiled fallback (~1.5x HBM traffic).
        # TODO(synk): single-pass manual streaming pipeline (pl.ANY +
        # make_async_copy) to keep one HBM read for huge per-batch slabs.
        max_st = block_budget // (C * (4 * itemsize + 4))
        st = _choose_spatial_tile(S, max_st)
        if st < 0:
            raise ValueError(
                "spatial extent cannot be tiled to a lane-aligned chunk that "
                "fits the VMEM budget")
        out = _two_pass_call(x3, w1, b1, w2, b2, st, vmem_limit)

    return out.reshape(B, C, D, H, W)


def channel_attention_reference(x, w1, b1, w2, b2):
    """Pure-JAX reference reproducing the PyTorch forward exactly."""
    B, C = x.shape[:2]
    y = x.reshape(B, C, -1).mean(axis=-1)                 # (B, C)
    h = jnp.maximum(y @ w1.T + b1, 0.0)                   # (B, C_sq)
    z = h @ w2.T + b2                                      # (B, C)
    s = 1.0 / (1.0 + jnp.exp(-z))                          # sigmoid
    return x * s[:, :, None, None, None]


if __name__ == "__main__":
    # Small shapes consistent with the module: num_feat=64, squeeze_factor=16,
    # spatial 16^3 (S = 4096, a multiple of 128 -> fully lane-dense tiles).
    B, C, Dd, Hh, Ww = 2, 64, 16, 16, 16
    SQUEEZE = 16
    C_SQ = C // SQUEEZE

    key = jax.random.PRNGKey(0)
    kx, k1, k2, k3, k4 = jax.random.split(key, 5)

    x = jax.random.normal(kx, (B, C, Dd, Hh, Ww), jnp.float32)

    s1 = 1.0 / math.sqrt(C)
    w1 = jax.random.uniform(k1, (C_SQ, C), jnp.float32, -s1, s1)
    b1 = jax.random.uniform(k2, (C_SQ,), jnp.float32, -s1, s1)
    s2 = 1.0 / math.sqrt(C_SQ)
    w2 = jax.random.uniform(k3, (C, C_SQ), jnp.float32, -s2, s2)
    b2 = jax.random.uniform(k4, (C,), jnp.float32, -s2, s2)

    ref = channel_attention_reference(x, w1, b1, w2, b2)

    # 1) Fused single-pass path (f32 I/O).
    out = jax.block_until_ready(channel_attention_pallas(x, w1, b1, w2, b2))
    assert out.shape == x.shape
    assert jnp.allclose(out, ref, atol=1e-5, rtol=1e-5), "fused f32 mismatch"

    # 2) Spatially-tiled two-pass fallback (forced via a tiny block budget) --
    #    the path used when a per-batch slab exceeds the 4x-buffered budget.
    out_fb = jax.block_until_ready(
        channel_attention_pallas(x, w1, b1, w2, b2, max_block_bytes=256 * 1024))
    assert jnp.allclose(out_fb, ref, atol=1e-5, rtol=1e-5), "fallback mismatch"

    # 3) bf16 I/O path (f32 math inside): halves HBM traffic on v6e/v7x.
    xb = x.astype(jnp.bfloat16)
    out_bf = jax.block_until_ready(channel_attention_pallas(xb, w1, b1, w2, b2))
    ref_bf = channel_attention_reference(xb.astype(jnp.float32), w1, b1, w2, b2)
    assert out_bf.dtype == jnp.bfloat16
    assert jnp.allclose(out_bf.astype(jnp.float32), ref_bf,
                        atol=5e-2, rtol=5e-2), "fused bf16 mismatch"

    print("KERNEL_OK")
</pallas_src>

<mosaic_0001>
module attributes {stable_mosaic.version = 11 : i64} {
  func.func @_ca_fused_kernel(%arg0: i32, %arg1: memref<1x64x4096xf32, #tpu.memory_space<vmem>>, %arg2: memref<64x4xf32, #tpu.memory_space<vmem>>, %arg3: memref<1x4xf32, #tpu.memory_space<vmem>>, %arg4: memref<4x64xf32, #tpu.memory_space<vmem>>, %arg5: memref<1x64xf32, #tpu.memory_space<vmem>>, %arg6: memref<1x64x4096xf32, #tpu.memory_space<vmem>>) attributes {dimension_semantics = [#tpu.dimension_semantics<parallel>], iteration_bounds = array<i64: 2>, scalar_prefetch = 0 : i64, scratch_operands = 0 : i64, tpu.core_type = #tpu.core_type<tc>, window_params = [{transform_indices = @transform_0, window_bounds = array<i64: 1, 64, 4096>}, {pipeline_mode = #tpu.pipeline_mode<synchronous>, transform_indices = @transform_1, window_bounds = array<i64: 64, 4>}, {pipeline_mode = #tpu.pipeline_mode<synchronous>, transform_indices = @transform_2, window_bounds = array<i64: 1, 4>}, {pipeline_mode = #tpu.pipeline_mode<synchronous>, transform_indices = @transform_3, window_bounds = array<i64: 4, 64>}, {pipeline_mode = #tpu.pipeline_mode<synchronous>, transform_indices = @transform_4, window_bounds = array<i64: 1, 64>}, {transform_indices = @transform_5, window_bounds = array<i64: 1, 64, 4096>}]} {
    %c0 = arith.constant 0 : index
    %c0_0 = arith.constant 0 : index
    %c0_1 = arith.constant 0 : index
    %0 = vector.load %arg1[%c0, %c0_0, %c0_1] : memref<1x64x4096xf32, #tpu.memory_space<vmem>>, vector<1x64x4096xf32>
    %cst = arith.constant dense<0.000000e+00> : vector<1x64xf32>
    %1 = vector.multi_reduction <add>, %0, %cst [2] : vector<1x64x4096xf32> to vector<1x64xf32>
    %cst_2 = arith.constant 2.44140625E-4 : f32
    %2 = vector.broadcast %cst_2 : f32 to vector<1x64xf32>
    %3 = arith.mulf %1, %2 : vector<1x64xf32>
    %c0_3 = arith.constant 0 : index
    %c0_4 = arith.constant 0 : index
    %4 = vector.load %arg2[%c0_3, %c0_4] : memref<64x4xf32, #tpu.memory_space<vmem>>, vector<64x4xf32>
    %cst_5 = arith.constant dense<0.000000e+00> : vector<1x4xf32>
    %5 = tpu.matmul %3, %4, %cst_5 {dimension_numbers = #tpu.dot_dimension_numbers<[1], [0], [0], [1], [0, 0, 1, 1], [], []>} : vector<1x64xf32>, vector<64x4xf32>, vector<1x4xf32> -> vector<1x4xf32>
    %c0_6 = arith.constant 0 : index
    %c0_7 = arith.constant 0 : index
    %6 = vector.load %arg3[%c0_6, %c0_7] : memref<1x4xf32, #tpu.memory_space<vmem>>, vector<1x4xf32>
    %7 = arith.addf %5, %6 : vector<1x4xf32>
    %cst_8 = arith.constant 0.000000e+00 : f32
    %8 = vector.broadcast %cst_8 : f32 to vector<1x4xf32>
    %9 = arith.maximumf %7, %8 : vector<1x4xf32>
    %c0_9 = arith.constant 0 : index
    %c0_10 = arith.constant 0 : index
    %10 = vector.load %arg4[%c0_9, %c0_10] : memref<4x64xf32, #tpu.memory_space<vmem>>, vector<4x64xf32>
    %cst_11 = arith.constant dense<0.000000e+00> : vector<1x64xf32>
    %11 = tpu.matmul %9, %10, %cst_11 {dimension_numbers = #tpu.dot_dimension_numbers<[1], [0], [0], [1], [0, 0, 1, 1], [], []>} : vector<1x4xf32>, vector<4x64xf32>, vector<1x64xf32> -> vector<1x64xf32>
    %c0_12 = arith.constant 0 : index
    %c0_13 = arith.constant 0 : index
    %12 = vector.load %arg5[%c0_12, %c0_13] : memref<1x64xf32, #tpu.memory_space<vmem>>, vector<1x64xf32>
    %13 = arith.addf %11, %12 : vector<1x64xf32>
    %cst_14 = arith.constant 0.000000e+00 : f32
    %14 = vector.broadcast %cst_14 : f32 to vector<1x64xf32>
    %15 = arith.subf %14, %13 : vector<1x64xf32>
    %16 = math.exp %15 : vector<1x64xf32>
    %cst_15 = arith.constant 1.000000e+00 : f32
    %17 = vector.broadcast %cst_15 : f32 to vector<1x64xf32>
    %18 = arith.addf %17, %16 : vector<1x64xf32>
    %cst_16 = arith.constant 1.000000e+00 : f32
    %19 = vector.broadcast %cst_16 : f32 to vector<1x64xf32>
    %20 = arith.divf %19, %18 : vector<1x64xf32>
    %21 = vector.shape_cast %20 : vector<1x64xf32> to vector<1x64x1xf32>
    %22 = vector.broadcast %21 : vector<1x64x1xf32> to vector<1x64x4096xf32>
    %23 = arith.mulf %0, %22 : vector<1x64x4096xf32>
    %c0_17 = arith.constant 0 : index
    %c0_18 = arith.constant 0 : index
    %c0_19 = arith.constant 0 : index
    %24 = vector.load %arg6[%c0_17, %c0_18, %c0_19] : memref<1x64x4096xf32, #tpu.memory_space<vmem>>, vector<1x64x4096xf32>
    tpu.vector_store %arg6[%c0_17, %c0_18, %c0_19], %23 {strides = array<i32>} : memref<1x64x4096xf32, #tpu.memory_space<vmem>>, vector<1x64x4096xf32>,
    return
  }
  func.func @transform_0(%arg0: i32) -> (i32, i32, i32) {
    %c0_i32 = arith.constant 0 : i32
    %c0_i32_0 = arith.constant 0 : i32
    %c0_i32_1 = arith.constant 0 : i32
    return %arg0, %c0_i32, %c0_i32_0 : i32, i32, i32
  }
  func.func @transform_1(%arg0: i32) -> (i32, i32) {
    %c0_i32 = arith.constant 0 : i32
    %c0_i32_0 = arith.constant 0 : i32
    %c0_i32_1 = arith.constant 0 : i32
    return %c0_i32, %c0_i32_0 : i32, i32
  }
  func.func @transform_2(%arg0: i32) -> (i32, i32) {
    %c0_i32 = arith.constant 0 : i32
    %c0_i32_0 = arith.constant 0 : i32
    %c0_i32_1 = arith.constant 0 : i32
    return %c0_i32, %c0_i32_0 : i32, i32
  }
  func.func @transform_3(%arg0: i32) -> (i32, i32) {
    %c0_i32 = arith.constant 0 : i32
    %c0_i32_0 = arith.constant 0 : i32
    %c0_i32_1 = arith.constant 0 : i32
    return %c0_i32, %c0_i32_0 : i32, i32
  }
  func.func @transform_4(%arg0: i32) -> (i32, i32) {
    %c0_i32 = arith.constant 0 : i32
    %c0_i32_0 = arith.constant 0 : i32
    %c0_i32_1 = arith.constant 0 : i32
    return %c0_i32, %c0_i32_0 : i32, i32
  }
  func.func @transform_5(%arg0: i32) -> (i32, i32, i32) {
    %c0_i32 = arith.constant 0 : i32
    %c0_i32_0 = arith.constant 0 : i32
    %c0_i32_1 = arith.constant 0 : i32
    return %arg0, %c0_i32, %c0_i32_0 : i32, i32, i32
  }
}

</mosaic_0001>

<bundles_post_ra>
// kernel: tpu_custom_call.1
= control target key start
LH: loop header
LB: loop body
LE: loop exit
PB: predicated region body
PF: predicated region fallthrough
CT: control target
= control target key end

     0   :  { %10 = vsyncpa [#allocation3], 0  ;;  %s3496_s0 = inlined_call_operand.hbm [shape: f32[2,64,4096], index: 0, kind: input, shape index: {}]   ;;  %s3497_s1 = inlined_call_operand.vmem [shape: f32[64,4], index: 1, kind: input, shape index: {}]   ;;  %s3498_s2 = inlined_call_operand.hbm [shape: f32[1,4], index: 2, kind: input, shape index: {}]   ;;  %s3499_s3 = inlined_call_operand.hbm [shape: f32[4,64], index: 3, kind: input, shape index: {}]   ;;  %s3500_s4 = inlined_call_operand.hbm [shape: f32[1,64], index: 4, kind: input, shape index: {}]   ;;  %s3501_s5 = inlined_call_operand.hbm [shape: f32[2,64,4096], index: 5, kind: output, shape index: {}]  }
   0x1   :  { %12 = vsyncpa [#allocation3 + $0x1], 0 }
   0x2   :  { %13 = vsyncpa [#allocation6], 0 }
   0x3   :  { %14 = vsyncpa [#allocation9], 0 }
   0x4   :  { %15 = vsyncpa [#allocation4], 0 }
   0x5   :  { %17 = vsyncpa [#allocation4 + $0x1], 0  ;;  %s2201_s18 = smov 0   ;;  %s2203_s19 = smov 0  }
   0x6   :  { %s2205_s20 = smov 0   ;;  %s2207_s21 = smov 0  }
   0x7 LB: > { %s2222_s22 = sadd.s32 4294967295, %s2162_s21   ;;  %s1617_s23 = sadd.s32 4294967294, %s2162_s21   ;;  %s2162_s21 = sphi %s2207_s21, %s3511_s21   ;;  %s2158_s20 = sphi %s2205_s20, %s3510_s20   ;;  %s2154_s19 = sphi %s2203_s19, %s3509_s19   ;;  %s2150_s18 = sphi %s2201_s18, %s3508_s18  }
   0x8   : > { %p43_p0 = scmp.ne.s32.totalorder %s2154_s19, %s2150_s18  ;;  %p44_p1 = scmp.eq.s32.totalorder %s2222_s22, 0 }
   0x9   : > { %p151_p2 = scmp.eq.s32.totalorder %s2222_s22, 1  ;;  %p157_p3 = scmp.eq.s32.totalorder %s1617_s23, 1 }
   0xa   : > { %p2231_p4 = por %p44_p1, %p43_p0  ;;  %p1618_p5 = scmp.ge.s32.totalorder %s2162_s21, 1 }
   0xb   : > { %p2236_p6 = por %p157_p3, %p43_p0  ;;  %p164_p7 = scmp.lt.s32.totalorder %s2162_s21, 3 }
   0xc   : > { %s179_s28 = sshll.u32 %s3498_s2, 4  ;;  %s2164_s30 = smov [#allocation5]   ;;  %s180_s28 = int_to_ptr.hbm [resolvable:$true] %s179_s28 }
   0xd   : > { %p2244_p8 = pnand %p1618_p5, %p164_p7  ;;  %s181_s6 = sshll.u32 %s2164_s30, 4  ;;  %s182_s6 = int_to_ptr.vmem [resolvable:$true] %s181_s6 }
   0xe   : > { %s191_s9 = sshll.u32 %s3499_s3, 4  ;;  %s203_s12 = sshll.u32 %s3500_s4, 4  ;;  %s192_s9 = int_to_ptr.hbm [resolvable:$true] %s191_s9  ;;  %s204_s12 = int_to_ptr.hbm [resolvable:$true] %s203_s12 }
   0xf   : > { %p1658_p10 = pneg %p2244_p8  ;;  %s2165_s13 = smov [#allocation7]  }
  0x10   : > { %s193_s14 = sshll.u32 %s2165_s13, 4  ;;  %s2166_s15 = smov [#allocation8]   ;;  %s194_s14 = int_to_ptr.vmem [resolvable:$true] %s193_s14 }
  0x11   : > { %p1659_p11 = pnand %p1658_p10, %p44_p1  ;;  %s205_s16 = sshll.u32 %s2166_s15, 4  ;;  %s206_s16 = int_to_ptr.vmem [resolvable:$true] %s205_s16 }
  0x12   : > { %s2260_s17 = sadd.s32 1, %s2162_s21   ;;  %s30_s26 = sadd.s32 1, %s2158_s20 }
  0x13   : > { %1661 = dma.hbm_to_vmem [thread:$0]  (!%p1659_p11), %s180_s28, 16, %s182_s6, [#allocation6]  }
  0x14   : > { %1664 = dma.hbm_to_vmem [thread:$0]  (!%p1659_p11), %s192_s9, 64, %s194_s14, [#allocation6]  }
  0x15   : > { %1667 = dma.hbm_to_vmem [thread:$0]  (!%p1659_p11), %s204_s12, 16, %s206_s16, [#allocation9]  }
  0x16   : > { %s27_s23 = ssub.s32 %s2162_s21, %s2260_s17  ;;  %p37_p13 = scmp.ne.s32.totalorder %s2158_s20, %s2154_s19 }
  0x17   : > { %p28_p12 = scmp.eq.s32.totalorder %s27_s23, 0  ;;  %p38_p0 = scmp.eq.s32.totalorder %s2162_s21, 0 }
  0x18   : > { %p1679_p3 = scmp.lt.s32.totalorder %s2162_s21, 2  ;;  %p2274_p7 = por %p151_p2, %p37_p13 }
  0x19   : > { %s2270_s27 = scalar_select %p28_p12, %s2158_s20, %s30_s26  }
  0x1a   : > { %p39_p5 = por %p38_p0, %p37_p13  ;;  %s216_s30 = sand.u32 1, %s2158_s20  }
  0x1b   : > { %s1640_s6 = sshll.u32 %s2162_s21, 11  ;;  %s1623_s7 = sshll.u32 %s216_s30, 11 }
  0x1c   : > { %s225_s10 = scalar_lea.hbm %s3496_s0, %s1640_s6  ;;  %s220_s12 = scalar_lea.vmem [#allocation2], %s1623_s7 }
  0x1d   : > { %s226_s11 = sshll.u32 %s225_s10, 4  ;;  %s228_s13 = sshll.u32 %s220_s12, 4  ;;  %s227_s11 = int_to_ptr.hbm [resolvable:$true] %s226_s11  ;;  %s229_s13 = int_to_ptr.vmem [resolvable:$true] %s228_s13 }
  0x1e   : > { %p2285_p10 = pnand %p1679_p3, %p39_p5  ;;  %s217_s15 = scalar_lea.sflag [#allocation3], %s216_s30 }
  0x1f   : > { %s2058_s16 = sshra.s32 %s227_s11, 4  ;;  %s2065_s7 = scalar_lea.hbm %s3496_s0, 4096  ;;  %s2059_s16 = int_to_ptr.hbm [resolvable:$true] %s2058_s16 }
  0x20   : > { %s2060_s23 = scalar_lea.hbm %s2059_s16, 2048  ;;  %p2062_p11 = pneg %p2285_p10 }
  0x21   : > { %p2061_p2 = scmp.ne.s32.totalorder %s2059_s16, %s2060_s23  ;;  %p2066_p0 = scmp.lt.s32.totalorder %s2059_s16, %s3496_s0 }
  0x22   : > { %p2067_p3 = scmp.lt.s32.totalorder %s2065_s7, %s2060_s23 }
  0x23   : > { %p2063_p12 = pnand %p2062_p11, %p2061_p2 }
  0x24   : > { %p2068_p5 = por %p2067_p3, %p2066_p0 }
  0x25   : > { %p2064_p13 = pneg %p2063_p12 }
  0x27   : > { %p2069_p9 = pnand %p2068_p5, %p2064_p13 }
  0x29   : > { %2072 = shalt.err (!%p2069_p9)
}
  0x2a   : > { %s2167_s30 = smov 4096   ;;  %s2168_s10 = smov 256  }
  0x2b   : > { %1671 = dma.hbm_to_vmem [thread:$0]  (!%p2285_p10), %s227_s11, 32768, %s229_s13, %s217_s15, %s2167_s30, %s2167_s30, %s2168_s10  }
  0x2c   : > { %240 = sbr.rel (%p2244_p8) target bundleno = 941 (0x3ad), region = 40  ;;  %s2302_s12 = sand.u32 (!%p2244_p8), 1, %s2154_s19  }
  0x2d   : > { %s1627_s16 = sshll.u32 (!%p2244_p8), %s2302_s12, 11  ;;  %s243_s23 = scalar_lea.sflag (!%p2244_p8), [#allocation3], %s2302_s12 }
  0x2e   : > { %s2308_s26 = scalar_lea.vmem (!%p2244_p8), [#allocation2], %s1627_s16 }
  0x31   : > { %2133 = dma.done.wait (%p2231_p4), %s243_s23, 32768  }
  0x32   : > { %2135 = vsyncadd (%p2231_p4), %s243_s23, 4294934528 }
  0x33   : > { %2137 = dma.done.wait (%p44_p1), [#allocation6], 80  }
  0x34   : > { %2139 = vsyncadd (%p44_p1), [#allocation6], 4294967216 }
  0x35   : > { %2141 = dma.done.wait (%p44_p1), [#allocation9], 16  }
  0x36   : > { %2143 = vsyncadd (%p44_p1), [#allocation9], 4294967280  ;;  %v289_v0 = vld [vmem:[%s2308_s26] sm:$0xff]  ;;  %v290_v1 = vld [vmem:[%s2308_s26 + $0x8] sm:$0xff]  ;;  %vm839_vm0 = vcmask 130112   ;;  %vm843_vm1 = vcmask 195712  }
  0x37   : > { %v291_v2 = vld [vmem:[%s2308_s26 + $0x10] sm:$0xff]  ;;  %v545_v3 = vadd.f32 %v290_v1, %v289_v0  ;;  %v292_v4 = vld [vmem:[%s2308_s26 + $0x18] sm:$0xff]  ;;  %v293_v6 = vld [vmem:[%s2308_s26 + $0x20] sm:$0xff]  ;;  %vm847_vm2 = vcmask 261312   ;;  %vm851_vm3 = vcmask 326912   ;;  %vm855_vm4 = vcmask 392512  }
  0x38   : > { %v294_v8 = vld [vmem:[%s2308_s26 + $0x28] sm:$0xff]  ;;  %v295_v10 = vld [vmem:[%s2308_s26 + $0x30] sm:$0xff]  ;;  %v296_v12 = vld [vmem:[%s2308_s26 + $0x38] sm:$0xff]  ;;  %vm859_vm5 = vcmask 458112   ;;  %vm863_vm6 = vcmask 523712   ;;  %vm865_vm7 = vcmask 523264  }
  0x39   : > { %v546_v5 = vadd.f32 %v545_v3, %v291_v2  ;;  %v353_v13 = vld [vmem:[%s2308_s26 + $0x200] sm:$0xff]  ;;  %v354_v15 = vld [vmem:[%s2308_s26 + $0x208] sm:$0xff]  ;;  %v355_v16 = vld [vmem:[%s2308_s26 + $0x210] sm:$0xff]  ;;  %vm895_vm8 = vcmask 1043456   ;;  %vm891_vm9 = vcmask 31744   ;;  %s2688_s13 = scalar_lea.vmem [#allocation10], %s1627_s16 }
  0x3a   : > { %v297_v17 = vld [vmem:[%s2308_s26 + $0x40] sm:$0xff]  ;;  %v611_v18 = vadd.f32 %v354_v15, %v353_v13  ;;  %v356_v20 = vld [vmem:[%s2308_s26 + $0x218] sm:$0xff]  ;;  %v298_v21 = vld [vmem:[%s2308_s26 + $0x48] sm:$0xff]  ;;  %s1641_s16 = sshll.u32 %s2222_s22, 11  ;;  %s1512_s6 = sshll.u32 %s2688_s13, 4  ;;  %s1513_s6 = int_to_ptr.vmem [resolvable:$true] %s1512_s6 }
  0x3b   : > { %v547_v7 = vadd.f32 %v546_v5, %v292_v4  ;;  %v357_v24 = vld [vmem:[%s2308_s26 + $0x220] sm:$0xff]  ;;  %v299_v25 = vld [vmem:[%s2308_s26 + $0x50] sm:$0xff]  ;;  %v358_v28 = vld [vmem:[%s2308_s26 + $0x228] sm:$0xff]  ;;  %s1511_s15 = scalar_lea.hbm %s3501_s5, %s1641_s16  ;;  %s1500_s8 = scalar_lea.sflag [#allocation4], %s2302_s12 }
  0x3c   : > { %v612_v22 = vadd.f32 %v611_v18, %v355_v16  ;;  %v417_v29 = vld [vmem:[%s2308_s26 + $0x400] sm:$0xff]  ;;  %v300_v30 = vld [vmem:[%s2308_s26 + $0x58] sm:$0xff]  ;;  %v418_v32 = vld [vmem:[%s2308_s26 + $0x408] sm:$0xff]  ;;  %s1514_s7 = sshll.u32 %s1511_s15, 4  ;;  %s1515_s7 = int_to_ptr.hbm [resolvable:$true] %s1514_s7 }
  0x3d   : > { %v548_v9 = vadd.f32 %v547_v7, %v293_v6  ;;  %v419_v33 = vld [vmem:[%s2308_s26 + $0x410] sm:$0xff]  ;;  %v677_v36 = vadd.f32 %v418_v32, %v417_v29  ;;  %v301_v37 = vld [vmem:[%s2308_s26 + $0x60] sm:$0xff]  ;;  %v420_v39 = vld [vmem:[%s2308_s26 + $0x418] sm:$0xff]  ;;  %s2102_s9 = sshra.s32 %s1515_s7, 4  ;;  %s2103_s9 = int_to_ptr.hbm [resolvable:$true] %s2102_s9 }
  0x3e   : > { %v613_v26 = vadd.f32 %v612_v22, %v356_v20  ;;  %v359_v35 = vld [vmem:[%s2308_s26 + $0x230] sm:$0xff]  ;;  %v360_v41 = vld [vmem:[%s2308_s26 + $0x238] sm:$0xff]  ;;  %v302_v43 = vld [vmem:[%s2308_s26 + $0x68] sm:$0xff]  ;;  %s2104_s30 = scalar_lea.hbm %s2103_s9, 2048  ;;  %p2109_p9 = scmp.lt.s32.totalorder %s2103_s9, %s3501_s5 }
  0x3f   : > { %v549_v11 = vadd.f32 %v548_v9, %v294_v8  ;;  %v678_v42 = vadd.f32 %v677_v36, %v419_v33  ;;  %v421_v45 = vld [vmem:[%s2308_s26 + $0x420] sm:$0xff]  ;;  %v303_v49 = vld [vmem:[%s2308_s26 + $0x70] sm:$0xff]  ;;  %v422_v51 = vld [vmem:[%s2308_s26 + $0x428] sm:$0xff]  ;;  %p2105_p1 = scmp.ne.s32.totalorder %s2103_s9, %s2104_s30 }
  0x40   : > { %v614_v31 = vadd.f32 %v613_v26, %v357_v24  ;;  %v361_v47 = vld [vmem:[%s2308_s26 + $0x240] sm:$0xff]  ;;  %v304_v52 = vld [vmem:[%s2308_s26 + $0x78] sm:$0xff]  ;;  %v362_v54 = vld [vmem:[%s2308_s26 + $0x248] sm:$0xff] }
  0x41   : > { %v550_v14 = vadd.f32 %v549_v11, %v295_v10  ;;  %v679_v48 = vadd.f32 %v678_v42, %v420_v39  ;;  %v423_v57 = vld [vmem:[%s2308_s26 + $0x430] sm:$0xff]  ;;  %v321_v58 = vld [vmem:[%s2308_s26 + $0x100] sm:$0xff]  ;;  %v322_v59 = vld [vmem:[%s2308_s26 + $0x108] sm:$0xff]  ;;  %p2106_p4 = pnand %p2105_p1, %p2274_p7 }
  0x42   : > { %v615_v38 = vadd.f32 %v614_v31, %v358_v28  ;;  %v363_v61 = vld [vmem:[%s2308_s26 + $0x250] sm:$0xff]  ;;  %v578_v0 = vadd.f32 %v322_v59, %v321_v58  ;;  %v305_v1 = vld [vmem:[%s2308_s26 + $0x80] sm:$0xff]  ;;  %v424_v3 = vld [vmem:[%s2308_s26 + $0x438] sm:$0xff] }
  0x43   : > { %v551_v19 = vadd.f32 %v550_v14, %v296_v12  ;;  %v680_v55 = vadd.f32 %v679_v48, %v421_v45  ;;  %v323_v63 = vld [vmem:[%s2308_s26 + $0x110] sm:$0xff]  ;;  %v324_v4 = vld [vmem:[%s2308_s26 + $0x118] sm:$0xff]  ;;  %v306_v9 = vld [vmem:[%s2308_s26 + $0x88] sm:$0xff]  ;;  %p2107_p8 = pneg %p2106_p4 }
  0x44   : > { %v616_v44 = vadd.f32 %v615_v38, %v359_v35  ;;  %v364_v6 = vld [vmem:[%s2308_s26 + $0x258] sm:$0xff]  ;;  %v579_v8 = vadd.f32 %v578_v0, %v323_v63  ;;  %v425_v11 = vld [vmem:[%s2308_s26 + $0x440] sm:$0xff]  ;;  %v326_v20 = vld [vmem:[%s2308_s26 + $0x128] sm:$0xff] }
  0x45   : > { %v552_v23 = vadd.f32 %v551_v19, %v297_v17  ;;  %v681_v62 = vadd.f32 %v680_v55, %v422_v51  ;;  %v325_v12 = vld [vmem:[%s2308_s26 + $0x120] sm:$0xff]  ;;  %v307_v17 = vld [vmem:[%s2308_s26 + $0x90] sm:$0xff]  ;;  %v426_v19 = vld [vmem:[%s2308_s26 + $0x448] sm:$0xff] }
  0x46   : > { %v617_v50 = vadd.f32 %v616_v44, %v360_v41  ;;  %v365_v14 = vld [vmem:[%s2308_s26 + $0x260] sm:$0xff]  ;;  %v580_v16 = vadd.f32 %v579_v8, %v324_v4  ;;  %v366_v22 = vld [vmem:[%s2308_s26 + $0x268] sm:$0xff]  ;;  %v327_v28 = vld [vmem:[%s2308_s26 + $0x130] sm:$0xff] }
  0x47   : > { %v553_v27 = vadd.f32 %v552_v23, %v298_v21  ;;  %v682_v7 = vadd.f32 %v681_v62, %v423_v57  ;;  %v309_v33 = vld [vmem:[%s2308_s26 + $0xa0] sm:$0xff]  ;;  %v428_v35 = vld [vmem:[%s2308_s26 + $0x458] sm:$0xff]  ;;  %v387_v51 = vld [vmem:[%s2308_s26 + $0x310] sm:$0xff] }
  0x48   : > { %v618_v56 = vadd.f32 %v617_v50, %v361_v47  ;;  %v581_v24 = vadd.f32 %v580_v16, %v325_v12  ;;  %v328_v36 = vld [vmem:[%s2308_s26 + $0x138] sm:$0xff]  ;;  %v329_v44 = vld [vmem:[%s2308_s26 + $0x140] sm:$0xff]  ;;  %v386_v50 = vld [vmem:[%s2308_s26 + $0x308] sm:$0xff] }
  0x49   : > { %v554_v34 = vadd.f32 %v553_v27, %v299_v25  ;;  %v683_v15 = vadd.f32 %v682_v7, %v424_v3  ;;  %v308_v25 = vld [vmem:[%s2308_s26 + $0x98] sm:$0xff]  ;;  %v427_v27 = vld [vmem:[%s2308_s26 + $0x450] sm:$0xff]  ;;  %v385_v45 = vld [vmem:[%s2308_s26 + $0x300] sm:$0xff] }
  0x4a   : > { %v619_v2 = vadd.f32 %v618_v56, %v362_v54  ;;  %v582_v32 = vadd.f32 %v581_v24, %v326_v20  ;;  %v368_v39 = vld [vmem:[%s2308_s26 + $0x278] sm:$0xff]  ;;  %v369_v47 = vld [vmem:[%s2308_s26 + $0x280] sm:$0xff]  ;;  %v430_v54 = vld [vmem:[%s2308_s26 + $0x468] sm:$0xff]  ;;  %v644_v56 = vadd.f32 %v386_v50, %v385_v45 }
  0x4b   : > { %v555_v40 = vadd.f32 %v554_v34, %v300_v30  ;;  %v684_v23 = vadd.f32 %v683_v15, %v425_v11  ;;  %v367_v30 = vld [vmem:[%s2308_s26 + $0x270] sm:$0xff]  ;;  %v330_v55 = vld [vmem:[%s2308_s26 + $0x148] sm:$0xff]  ;;  %v312_v62 = vld [vmem:[%s2308_s26 + $0xb8] sm:$0xff] }
  0x4c   : > { %v620_v10 = vadd.f32 %v619_v2, %v363_v61  ;;  %v583_v41 = vadd.f32 %v582_v32, %v327_v28  ;;  %v370_v58 = vld [vmem:[%s2308_s26 + $0x288] sm:$0xff]  ;;  %v388_v61 = vld [vmem:[%s2308_s26 + $0x318] sm:$0xff]  ;;  %v431_v0 = vld [vmem:[%s2308_s26 + $0x470] sm:$0xff]  ;;  %v645_v2 = vadd.f32 %v644_v56, %v387_v51 }
  0x4d   : > { %v556_v46 = vadd.f32 %v555_v40, %v301_v37  ;;  %v685_v31 = vadd.f32 %v684_v23, %v426_v19  ;;  %v310_v37 = vld [vmem:[%s2308_s26 + $0xa8] sm:$0xff]  ;;  %v371_v4 = vld [vmem:[%s2308_s26 + $0x290] sm:$0xff]  ;;  %v389_v7 = vld [vmem:[%s2308_s26 + $0x320] sm:$0xff] }
  0x4e   : > { %v621_v18 = vadd.f32 %v620_v10, %v364_v6  ;;  %v313_v8 = vld [vmem:[%s2308_s26 + $0xc0] sm:$0xff]  ;;  %v432_v10 = vld [vmem:[%s2308_s26 + $0x478] sm:$0xff]  ;;  %v646_v12 = vadd.f32 %v645_v2, %v388_v61  ;;  %v315_v23 = vld [vmem:[%s2308_s26 + $0xd0] sm:$0xff] }
  0x4f   : > { %v557_v53 = vadd.f32 %v556_v46, %v302_v43  ;;  %v686_v40 = vadd.f32 %v685_v31, %v427_v27  ;;  %v429_v43 = vld [vmem:[%s2308_s26 + $0x460] sm:$0xff]  ;;  %v332_v11 = vld [vmem:[%s2308_s26 + $0x158] sm:$0xff]  ;;  %v391_v28 = vld [vmem:[%s2308_s26 + $0x330] sm:$0xff] }
  0x50   : > { %v622_v26 = vadd.f32 %v621_v18, %v365_v14  ;;  %v372_v14 = vld [vmem:[%s2308_s26 + $0x298] sm:$0xff]  ;;  %v314_v18 = vld [vmem:[%s2308_s26 + $0xc8] sm:$0xff]  ;;  %v433_v20 = vld [vmem:[%s2308_s26 + $0x480] sm:$0xff] }
  0x51   : > { %v558_v60 = vadd.f32 %v557_v53, %v303_v49  ;;  %v687_v48 = vadd.f32 %v686_v40, %v428_v35  ;;  %v584_v49 = vadd.f32 %v583_v41, %v328_v36  ;;  %v434_v31 = vld [vmem:[%s2308_s26 + $0x488] sm:$0xff]  ;;  %v435_v36 = vld [vmem:[%s2308_s26 + $0x490] sm:$0xff]  ;;  %v317_v40 = vld [vmem:[%s2308_s26 + $0xe0] sm:$0xff] }
  0x52   : > { %v623_v34 = vadd.f32 %v622_v26, %v366_v22  ;;  %v647_v22 = vadd.f32 %v646_v12, %v389_v7  ;;  %v334_v32 = vld [vmem:[%s2308_s26 + $0x168] sm:$0xff]  ;;  %v393_v50 = vld [vmem:[%s2308_s26 + $0x340] sm:$0xff]  ;;  %v451_v51 = vld [vmem:[%s2308_s26 + $0x510] sm:$0xff] }
  0x53   : > { %v559_v5 = vadd.f32 %v558_v60, %v304_v52  ;;  %v311_v52 = vld [vmem:[%s2308_s26 + $0xb0] sm:$0xff]  ;;  %v688_v59 = vadd.f32 %v687_v48, %v429_v43  ;;  %v585_v60 = vadd.f32 %v584_v49, %v329_v44  ;;  %v374_v35 = vld [vmem:[%s2308_s26 + $0x2a8] sm:$0xff]  ;;  %v449_v44 = vld [vmem:[%s2308_s26 + $0x500] sm:$0xff] }
  0x54   : > { %v624_v42 = vadd.f32 %v623_v34, %v367_v30  ;;  %v450_v45 = vld [vmem:[%s2308_s26 + $0x508] sm:$0xff]  ;;  %v437_v2 = vld [vmem:[%s2308_s26 + $0x4a0] sm:$0xff] }
  0x55   : > { %v560_v13 = vadd.f32 %v559_v5, %v305_v1  ;;  %v331_v1 = vld [vmem:[%s2308_s26 + $0x150] sm:$0xff]  ;;  %v689_v5 = vadd.f32 %v688_v59, %v430_v54  ;;  %v586_v6 = vadd.f32 %v585_v60, %v330_v55  ;;  %v436_v54 = vld [vmem:[%s2308_s26 + $0x498] sm:$0xff] }
  0x56   : > { %v625_v53 = vadd.f32 %v624_v42, %v368_v39  ;;  %v392_v39 = vld [vmem:[%s2308_s26 + $0x338] sm:$0xff]  ;;  %v335_v42 = vld [vmem:[%s2308_s26 + $0x170] sm:$0xff] }
  0x57   : > { %v561_v21 = vadd.f32 %v560_v13, %v306_v9  ;;  %v690_v15 = vadd.f32 %v689_v5, %v431_v0  ;;  %v587_v16 = vadd.f32 %v586_v6, %v331_v1  ;;  %v336_v55 = vld [vmem:[%s2308_s26 + $0x178] sm:$0xff]  ;;  %v453_v5 = vld [vmem:[%s2308_s26 + $0x520] sm:$0xff]  ;;  %v2432_v6 = vld [vmem:[%s2308_s26 + $0xf0] sm:$0xff] }
  0x58   : > { %v626_v63 = vadd.f32 %v625_v53, %v369_v47  ;;  %v375_v47 = vld [vmem:[%s2308_s26 + $0x2b0] sm:$0xff]  ;;  %v376_v60 = vld [vmem:[%s2308_s26 + $0x2b8] sm:$0xff] }
  0x59   : > { %v562_v29 = vadd.f32 %v561_v21, %v307_v17  ;;  %v390_v17 = vld [vmem:[%s2308_s26 + $0x328] sm:$0xff]  ;;  %v333_v21 = vld [vmem:[%s2308_s26 + $0x160] sm:$0xff]  ;;  %v691_v26 = vadd.f32 %v690_v15, %v432_v10  ;;  %v588_v27 = vadd.f32 %v587_v16, %v332_v11  ;;  %v395_v11 = vld [vmem:[%s2308_s26 + $0x350] sm:$0xff] }
  0x5a   : > { %v627_v9 = vadd.f32 %v626_v63, %v370_v58  ;;  %v2424_v58 = vld [vmem:[%s2308_s26 + $0xe8] sm:$0xff] }
  0x5b   : > { %v563_v38 = vadd.f32 %v562_v29, %v308_v25  ;;  %v373_v25 = vld [vmem:[%s2308_s26 + $0x2a0] sm:$0xff]  ;;  %v316_v29 = vld [vmem:[%s2308_s26 + $0xd8] sm:$0xff]  ;;  %v394_v63 = vld [vmem:[%s2308_s26 + $0x348] sm:$0xff] }
  0x5c   : > { %v628_v19 = vadd.f32 %v627_v9, %v371_v4  ;;  %v438_v15 = vld [vmem:[%s2308_s26 + $0x4a8] sm:$0xff] }
  0x5d   : > { %v564_v46 = vadd.f32 %v563_v38, %v309_v33  ;;  %v648_v33 = vadd.f32 %v647_v22, %v390_v17  ;;  %v589_v38 = vadd.f32 %v588_v27, %v333_v21  ;;  %v338_v16 = vld [vmem:[%s2308_s26 + $0x188] sm:$0xff]  ;;  %v439_v21 = vld [vmem:[%s2308_s26 + $0x4b0] sm:$0xff] }
  0x5e   : > { %v629_v30 = vadd.f32 %v628_v19, %v372_v14 }
  0x5f   : > { %v565_v57 = vadd.f32 %v564_v46, %v310_v37  ;;  %v692_v37 = vadd.f32 %v691_v26, %v433_v20  ;;  %v649_v43 = vadd.f32 %v648_v33, %v391_v28  ;;  %v590_v49 = vadd.f32 %v589_v38, %v334_v32  ;;  %v378_v20 = vld [vmem:[%s2308_s26 + $0x2c8] sm:$0xff]  ;;  %v379_v26 = vld [vmem:[%s2308_s26 + $0x2d0] sm:$0xff]  ;;  %v380_v32 = vld [vmem:[%s2308_s26 + $0x2d8] sm:$0xff] }
  0x60   : > { %v630_v41 = vadd.f32 %v629_v30, %v373_v25  ;;  %v339_v28 = vld [vmem:[%s2308_s26 + $0x190] sm:$0xff]  ;;  %v440_v33 = vld [vmem:[%s2308_s26 + $0x4b8] sm:$0xff] }
  0x61   : > { %v566_v3 = vadd.f32 %v565_v57, %v311_v52  ;;  %v693_v48 = vadd.f32 %v692_v37, %v434_v31  ;;  %v710_v52 = vadd.f32 %v450_v45, %v449_v44  ;;  %v650_v56 = vadd.f32 %v649_v43, %v392_v39  ;;  %v452_v57 = vld [vmem:[%s2308_s26 + $0x518] sm:$0xff]  ;;  %v455_v30 = vld [vmem:[%s2308_s26 + $0x530] sm:$0xff]  ;;  %v381_v44 = vld [vmem:[%s2308_s26 + $0x2e0] sm:$0xff] }
  0x62   : > { %v631_v53 = vadd.f32 %v630_v41, %v374_v35  ;;  %v340_v39 = vld [vmem:[%s2308_s26 + $0x198] sm:$0xff] }
  0x63   : > { %v567_v13 = vadd.f32 %v566_v3, %v312_v62  ;;  %v694_v61 = vadd.f32 %v693_v48, %v435_v36  ;;  %v591_v62 = vadd.f32 %v590_v49, %v335_v42  ;;  %v711_v0 = vadd.f32 %v710_v52, %v451_v51  ;;  %v337_v3 = vld [vmem:[%s2308_s26 + $0x180] sm:$0xff]  ;;  %v456_v42 = vld [vmem:[%s2308_s26 + $0x538] sm:$0xff]  ;;  %v482_v49 = vld [vmem:[%s2308_s26 + $0x608] sm:$0xff] }
  0x64   : > { %v632_v1 = vadd.f32 %v631_v53, %v375_v47  ;;  %v651_v4 = vadd.f32 %v650_v56, %v393_v50  ;;  %v2455_v36 = vld [vmem:[%s2308_s26 + $0x360] sm:$0xff]  ;;  %v483_v50 = vld [vmem:[%s2308_s26 + $0x610] sm:$0xff] }
  0x65   : > { %v568_v24 = vadd.f32 %v567_v13, %v313_v8  ;;  %v377_v8 = vld [vmem:[%s2308_s26 + $0x2c0] sm:$0xff]  ;;  %v695_v9 = vadd.f32 %v694_v61, %v436_v54  ;;  %v592_v10 = vadd.f32 %v591_v62, %v336_v55  ;;  %v712_v12 = vadd.f32 %v711_v0, %v452_v57  ;;  %v2437_v13 = vld [vmem:[%s2308_s26 + $0xf8] sm:$0xff]  ;;  %v382_v57 = vld [vmem:[%s2308_s26 + $0x2e8] sm:$0xff] }
  0x66   : > { %v633_v14 = vadd.f32 %v632_v1, %v376_v60  ;;  %v652_v17 = vadd.f32 %v651_v4, %v394_v63  ;;  %v481_v48 = vld [vmem:[%s2308_s26 + $0x600] sm:$0xff]  ;;  %v2474_v61 = vld [vmem:[%s2308_s26 + $0x370] sm:$0xff]  ;;  %v484_v63 = vld [vmem:[%s2308_s26 + $0x618] sm:$0xff] }
  0x67   : > { %v569_v34 = vadd.f32 %v568_v24, %v314_v18  ;;  %v454_v18 = vld [vmem:[%s2308_s26 + $0x528] sm:$0xff]  ;;  %v696_v22 = vadd.f32 %v695_v9, %v437_v2  ;;  %v2446_v24 = vld [vmem:[%s2308_s26 + $0x358] sm:$0xff]  ;;  %v713_v25 = vadd.f32 %v712_v12, %v453_v5  ;;  %v441_v52 = vld [vmem:[%s2308_s26 + $0x4c0] sm:$0xff]  ;;  %v743_v56 = vadd.f32 %v482_v49, %v481_v48 }
  0x68   : > { %v634_v27 = vadd.f32 %v633_v14, %v377_v8  ;;  %v341_v53 = vld [vmem:[%s2308_s26 + $0x1a0] sm:$0xff]  ;;  %v442_v1 = vld [vmem:[%s2308_s26 + $0x4c8] sm:$0xff] }
  0x69   : > { %v570_v46 = vadd.f32 %v569_v34, %v315_v23  ;;  %v593_v23 = vadd.f32 %v592_v10, %v337_v3  ;;  %v697_v34 = vadd.f32 %v696_v22, %v438_v15  ;;  %v714_v37 = vadd.f32 %v713_v25, %v454_v18  ;;  %v457_v55 = vld [vmem:[%s2308_s26 + $0x540] sm:$0xff]  ;;  %v342_v2 = vld [vmem:[%s2308_s26 + $0x1a8] sm:$0xff]  ;;  %v2483_v10 = vld [vmem:[%s2308_s26 + $0x378] sm:$0xff] }
  0x6a   : > { %v635_v38 = vadd.f32 %v634_v27, %v378_v20  ;;  %v458_v4 = vld [vmem:[%s2308_s26 + $0x548] sm:$0xff]  ;;  %v744_v5 = vadd.f32 %v743_v56, %v483_v50  ;;  %v485_v12 = vld [vmem:[%s2308_s26 + $0x620] sm:$0xff]  ;;  %v443_v15 = vld [vmem:[%s2308_s26 + $0x4d0] sm:$0xff] }
  0x6b   : > { %v571_v59 = vadd.f32 %v570_v46, %v316_v29  ;;  %v653_v29 = vadd.f32 %v652_v17, %v395_v11  ;;  %v594_v35 = vadd.f32 %v593_v23, %v338_v16  ;;  %v698_v45 = vadd.f32 %v697_v34, %v439_v21  ;;  %v343_v16 = vld [vmem:[%s2308_s26 + $0x1b0] sm:$0xff]  ;;  %v384_v20 = vld [vmem:[%s2308_s26 + $0x2f8] sm:$0xff]  ;;  %v2493_v25 = vld [vmem:[%s2308_s26 + $0x380] sm:$0xff] }
  0x6c   : > { %v715_v47 = vadd.f32 %v714_v37, %v455_v30  ;;  %v636_v51 = vadd.f32 %v635_v38, %v379_v26  ;;  %v459_v18 = vld [vmem:[%s2308_s26 + $0x550] sm:$0xff]  ;;  %v444_v21 = vld [vmem:[%s2308_s26 + $0x4d8] sm:$0xff]  ;;  %v486_v27 = vld [vmem:[%s2308_s26 + $0x628] sm:$0xff] }
  0x6d   : > { %v572_v7 = vadd.f32 %v571_v59, %v317_v40  ;;  %v2459_v40 = vld [vmem:[%s2308_s26 + $0x368] sm:$0xff]  ;;  %v654_v41 = vadd.f32 %v653_v29, %v2446_v24  ;;  %v595_v46 = vadd.f32 %v594_v35, %v339_v28  ;;  %v699_v59 = vadd.f32 %v698_v45, %v440_v33  ;;  %v445_v29 = vld [vmem:[%s2308_s26 + $0x4e0] sm:$0xff]  ;;  %v344_v30 = vld [vmem:[%s2308_s26 + $0x1b8] sm:$0xff] }
  0x6e   : > { %v716_v62 = vadd.f32 %v715_v47, %v456_v42  ;;  %v637_v0 = vadd.f32 %v636_v51, %v380_v32  ;;  %v460_v32 = vld [vmem:[%s2308_s26 + $0x558] sm:$0xff]  ;;  %v345_v35 = vld [vmem:[%s2308_s26 + $0x1c0] sm:$0xff]  ;;  %v2502_v38 = vld [vmem:[%s2308_s26 + $0x388] sm:$0xff] }
  0x6f   : > { %v573_v19 = vadd.f32 %v572_v7, %v2424_v58  ;;  %v655_v54 = vadd.f32 %v654_v41, %v2455_v36  ;;  %v596_v60 = vadd.f32 %v595_v46, %v340_v39  ;;  %v383_v7 = vld [vmem:[%s2308_s26 + $0x2f0] sm:$0xff]  ;;  %v700_v8 = vadd.f32 %v699_v59, %v441_v52  ;;  %v461_v45 = vld [vmem:[%s2308_s26 + $0x560] sm:$0xff]  ;;  %v346_v49 = vld [vmem:[%s2308_s26 + $0x1c8] sm:$0xff] }
  0x70   : > { %v717_v11 = vadd.f32 %v716_v62, %v457_v55  ;;  %v638_v14 = vadd.f32 %v637_v0, %v381_v44  ;;  %v487_v41 = vld [vmem:[%s2308_s26 + $0x630] sm:$0xff]  ;;  %v513_v47 = vld [vmem:[%s2308_s26 + $0x700] sm:$0xff]  ;;  %v462_v56 = vld [vmem:[%s2308_s26 + $0x568] sm:$0xff] }
  0x71   : > { %v574_v31 = vadd.f32 %v573_v19, %v2432_v6  ;;  %v656_v3 = vadd.f32 %v655_v54, %v2459_v40  ;;  %v597_v9 = vadd.f32 %v596_v60, %v341_v53  ;;  %v745_v19 = vadd.f32 %v744_v5, %v484_v63  ;;  %v2511_v51 = vld [vmem:[%s2308_s26 + $0x390] sm:$0xff]  ;;  %v488_v53 = vld [vmem:[%s2308_s26 + $0x638] sm:$0xff]  ;;  %v514_v59 = vld [vmem:[%s2308_s26 + $0x708] sm:$0xff] }
  0x72   : > { %v701_v22 = vadd.f32 %v700_v8, %v442_v1  ;;  %v718_v26 = vadd.f32 %v717_v11, %v458_v4  ;;  %v639_v28 = vadd.f32 %v638_v14, %v382_v57  ;;  %v515_v60 = vld [vmem:[%s2308_s26 + $0x710] sm:$0xff]  ;;  %v2520_v1 = vld [vmem:[%s2308_s26 + $0x398] sm:$0xff]  ;;  %v776_v4 = vadd.f32 %v514_v59, %v513_v47  ;;  %v350_v47 = vld [vmem:[%s2308_s26 + $0x1e8] sm:$0xff] }
  0x73   : > { %v575_v43 = vadd.f32 %v574_v31, %v2437_v13  ;;  %v657_v17 = vadd.f32 %v656_v3, %v2474_v61  ;;  %v598_v23 = vadd.f32 %v597_v9, %v342_v2  ;;  %v746_v33 = vadd.f32 %v745_v19, %v485_v12  ;;  %v447_v62 = vld [vmem:[%s2308_s26 + $0x4f0] sm:$0xff]  ;;  %v489_v3 = vld [vmem:[%s2308_s26 + $0x640] sm:$0xff]  ;;  %v516_v11 = vld [vmem:[%s2308_s26 + $0x718] sm:$0xff] }
  0x74   : > { %v702_v34 = vadd.f32 %v701_v22, %v443_v15  ;;  %v719_v39 = vadd.f32 %v718_v26, %v459_v18  ;;  %v640_v42 = vadd.f32 %v639_v28, %v383_v7  ;;  %v347_v5 = vld [vmem:[%s2308_s26 + $0x1d0] sm:$0xff]  ;;  %v448_v12 = vld [vmem:[%s2308_s26 + $0x4f8] sm:$0xff]  ;;  %v490_v18 = vld [vmem:[%s2308_s26 + $0x648] sm:$0xff]  ;;  %v777_v19 = vadd.f32 %v776_v4, %v515_v60 }
  0x75   : > { %576 = vadd.xlane.f32.xlu0 %v575_v43  ;;  %v658_v31 = vadd.f32 %v657_v17, %v2483_v10  ;;  %v599_v37 = vadd.f32 %v598_v23, %v343_v16  ;;  %v446_v43 = vld [vmem:[%s2308_s26 + $0x4e8] sm:$0xff]  ;;  %v747_v46 = vadd.f32 %v746_v33, %v486_v27  ;;  %v463_v8 = vld [vmem:[%s2308_s26 + $0x570] sm:$0xff]  ;;  %v2529_v16 = vld [vmem:[%s2308_s26 + $0x3a0] sm:$0xff] }
  0x76   : > { %v703_v48 = vadd.f32 %v702_v34, %v444_v21  ;;  %v720_v52 = vadd.f32 %v719_v39, %v460_v32  ;;  %v641_v54 = vadd.f32 %v640_v42, %v384_v20  ;;  %v348_v20 = vld [vmem:[%s2308_s26 + $0x1d8] sm:$0xff]  ;;  %v517_v26 = vld [vmem:[%s2308_s26 + $0x720] sm:$0xff]  ;;  %v778_v32 = vadd.f32 %v777_v19, %v516_v11  ;;  %v518_v39 = vld [vmem:[%s2308_s26 + $0x728] sm:$0xff] }
  0x77   : > { %v659_v44 = vadd.f32 %v658_v31, %v2493_v25  ;;  %v600_v50 = vadd.f32 %v599_v37, %v344_v30  ;;  %v748_v57 = vadd.f32 %v747_v46, %v487_v41  ;;  %v464_v22 = vld [vmem:[%s2308_s26 + $0x578] sm:$0xff]  ;;  %v491_v31 = vld [vmem:[%s2308_s26 + $0x650] sm:$0xff]  ;;  %v349_v33 = vld [vmem:[%s2308_s26 + $0x1e0] sm:$0xff] }
  0x78   : > { %v704_v63 = vadd.f32 %v703_v48, %v445_v29  ;;  %v721_v2 = vadd.f32 %v720_v52, %v461_v45  ;;  %642 = vadd.xlane.f32.xlu1 %v641_v54  ;;  %v2537_v29 = vld [vmem:[%s2308_s26 + $0x3a8] sm:$0xff]  ;;  %v492_v45 = vld [vmem:[%s2308_s26 + $0x658] sm:$0xff]  ;;  %v779_v46 = vadd.f32 %v778_v32, %v517_v26  ;;  %v519_v52 = vld [vmem:[%s2308_s26 + $0x730] sm:$0xff] }
  0x79   : > { %v660_v55 = vadd.f32 %v659_v44, %v2502_v38  ;;  %v601_v0 = vadd.f32 %v600_v50, %v345_v35  ;;  %v749_v9 = vadd.f32 %v748_v57, %v488_v53  ;;  %v465_v35 = vld [vmem:[%s2308_s26 + $0x580] sm:$0xff]  ;;  %v2553_v54 = vld [vmem:[%s2308_s26 + $0x3b8] sm:$0xff]  ;;  %v351_v59 = vld [vmem:[%s2308_s26 + $0x1f0] sm:$0xff] }
  0x7a   : > { %v705_v14 = vadd.f32 %v704_v63, %v446_v43  ;;  %v722_v17 = vadd.f32 %v721_v2, %v462_v56  ;;  %v2545_v43 = vld [vmem:[%s2308_s26 + $0x3b0] sm:$0xff]  ;;  %v493_v56 = vld [vmem:[%s2308_s26 + $0x660] sm:$0xff]  ;;  %v780_v57 = vadd.f32 %v779_v46, %v518_v39  ;;  %v468_v11 = vld [vmem:[%s2308_s26 + $0x598] sm:$0xff] }
  0x7b   : > { %v661_v7 = vadd.f32 %v660_v55, %v2511_v51  ;;  %v602_v15 = vadd.f32 %v601_v0, %v346_v49  ;;  %v750_v23 = vadd.f32 %v749_v9, %v489_v3  ;;  %v466_v49 = vld [vmem:[%s2308_s26 + $0x588] sm:$0xff]  ;;  %v520_v0 = vld [vmem:[%s2308_s26 + $0x738] sm:$0xff]  ;;  %v2561_v3 = vld [vmem:[%s2308_s26 + $0x3c0] sm:$0xff] }
  0x7c   : > { %v706_v27 = vadd.f32 %v705_v14, %v447_v62  ;;  %v723_v30 = vadd.f32 %v722_v17, %v463_v8  ;;  %v467_v62 = vld [vmem:[%s2308_s26 + $0x590] sm:$0xff]  ;;  %v352_v8 = vld [vmem:[%s2308_s26 + $0x1f8] sm:$0xff]  ;;  %v521_v14 = vld [vmem:[%s2308_s26 + $0x740] sm:$0xff] }
  0x7d   : > { %v662_v21 = vadd.f32 %v661_v7, %v2520_v1  ;;  %v603_v28 = vadd.f32 %v602_v15, %v347_v5  ;;  %v751_v37 = vadd.f32 %v750_v23, %v490_v18  ;;  %v494_v5 = vld [vmem:[%s2308_s26 + $0x668] sm:$0xff]  ;;  %v781_v7 = vadd.f32 %v780_v57, %v519_v52  ;;  %v495_v19 = vld [vmem:[%s2308_s26 + $0x670] sm:$0xff]  ;;  %v2583_v39 = vld [vmem:[%s2308_s26 + $0x3d8] sm:$0xff] }
  0x7e   : > { %v707_v41 = vadd.f32 %v706_v27, %v448_v12  ;;  %v724_v44 = vadd.f32 %v723_v30, %v464_v22  ;;  %v2569_v17 = vld [vmem:[%s2308_s26 + $0x3c8] sm:$0xff]  ;;  %v469_v22 = vld [vmem:[%s2308_s26 + $0x5a0] sm:$0xff]  ;;  %v471_v46 = vld [vmem:[%s2308_s26 + $0x5b0] sm:$0xff] }
  0x7f   : > { %v663_v34 = vadd.f32 %v662_v21, %v2529_v16  ;;  %v604_v42 = vadd.f32 %v603_v28, %v348_v20  ;;  %v752_v50 = vadd.f32 %v751_v37, %v491_v31  ;;  %v782_v20 = vadd.f32 %v781_v7, %v520_v0  ;;  %v522_v26 = vld [vmem:[%s2308_s26 + $0x748] sm:$0xff]  ;;  %v2576_v28 = vld [vmem:[%s2308_s26 + $0x3d0] sm:$0xff]  ;;  %v496_v31 = vld [vmem:[%s2308_s26 + $0x678] sm:$0xff] }
  0x80   : > { %708 = vadd.xlane.f32.xlu2 %v707_v41  ;;  %v725_v55 = vadd.f32 %v724_v44, %v465_v35  ;;  %v523_v37 = vld [vmem:[%s2308_s26 + $0x750] sm:$0xff]  ;;  %v498_v52 = vld [vmem:[%s2308_s26 + $0x688] sm:$0xff] }
  0x81   : > { %v664_v48 = vadd.f32 %v663_v34, %v2537_v29  ;;  %v605_v53 = vadd.f32 %v604_v42, %v349_v33  ;;  %v753_v63 = vadd.f32 %v752_v50, %v492_v45  ;;  %v783_v32 = vadd.f32 %v782_v20, %v521_v14  ;;  %v470_v34 = vld [vmem:[%s2308_s26 + $0x5a8] sm:$0xff]  ;;  %v497_v42 = vld [vmem:[%s2308_s26 + $0x680] sm:$0xff]  ;;  %v2611_v20 = vld [vmem:[%s2308_s26 + $0x3f8] sm:$0xff] }
  0x82   : > { %v726_v4 = vadd.f32 %v725_v55, %v466_v49  ;;  %v2590_v49 = vld [vmem:[%s2308_s26 + $0x3e0] sm:$0xff]  ;;  %v526_v7 = vld [vmem:[%s2308_s26 + $0x768] sm:$0xff] }
  0x83   : > { %v665_v60 = vadd.f32 %v664_v48, %v2545_v43  ;;  %v606_v2 = vadd.f32 %v605_v53, %v350_v47  ;;  %v754_v12 = vadd.f32 %v753_v63, %v493_v56  ;;  %v784_v44 = vadd.f32 %v783_v32, %v522_v26  ;;  %v524_v48 = vld [vmem:[%s2308_s26 + $0x758] sm:$0xff]  ;;  %v499_v63 = vld [vmem:[%s2308_s26 + $0x690] sm:$0xff] }
  0x84   : > { %v727_v18 = vadd.f32 %v726_v4, %v467_v62  ;;  %v472_v56 = vld [vmem:[%s2308_s26 + $0x5b8] sm:$0xff]  ;;  %v473_v4 = vld [vmem:[%s2308_s26 + $0x5c0] sm:$0xff] }
  0x85   : > { %v666_v9 = vadd.f32 %v665_v60, %v2553_v54  ;;  %v607_v15 = vadd.f32 %v606_v2, %v351_v59  ;;  %v755_v23 = vadd.f32 %v754_v12, %v494_v5  ;;  %v785_v53 = vadd.f32 %v784_v44, %v523_v37  ;;  %v525_v59 = vld [vmem:[%s2308_s26 + $0x760] sm:$0xff]  ;;  %v2597_v60 = vld [vmem:[%s2308_s26 + $0x3e8] sm:$0xff]  ;;  %v476_v37 = vld [vmem:[%s2308_s26 + $0x5d8] sm:$0xff] }
  0x86   : > { %v728_v30 = vadd.f32 %v727_v18, %v468_v11  ;;  %v500_v11 = vld [vmem:[%s2308_s26 + $0x698] sm:$0xff] }
  0x87   : > { %v667_v21 = vadd.f32 %v666_v9, %v2561_v3  ;;  %v608_v27 = vadd.f32 %v607_v15, %v352_v8  ;;  %v756_v35 = vadd.f32 %v755_v23, %v495_v19  ;;  %v786_v0 = vadd.f32 %v785_v53, %v524_v48  ;;  %v2604_v8 = vld [vmem:[%s2308_s26 + $0x3f0] sm:$0xff]  ;;  %v474_v15 = vld [vmem:[%s2308_s26 + $0x5c8] sm:$0xff]  ;;  %v504_v53 = vld [vmem:[%s2308_s26 + $0x6b8] sm:$0xff] }
  0x88   : > { %v729_v41 = vadd.f32 %v728_v30, %v469_v22  ;;  %v527_v19 = vld [vmem:[%s2308_s26 + $0x770] sm:$0xff]  ;;  %v501_v22 = vld [vmem:[%s2308_s26 + $0x6a0] sm:$0xff] }
  0x89   : > { %v668_v33 = vadd.f32 %v667_v21, %v2569_v17  ;;  %609 = vadd.xlane.f32.xlu0 %v608_v27  ;;  %v757_v47 = vadd.f32 %v756_v35, %v496_v31  ;;  %v787_v12 = vadd.f32 %v786_v0, %v525_v59  ;;  %v475_v27 = vld [vmem:[%s2308_s26 + $0x5d0] sm:$0xff]  ;;  %v528_v31 = vld [vmem:[%s2308_s26 + $0x778] sm:$0xff] }
  0x8a   : > { %v730_v50 = vadd.f32 %v729_v41, %v470_v34  ;;  %v531_v59 = vld [vmem:[%s2308_s26 + $0x790] sm:$0xff] }
  0x8b   : > { %v669_v45 = vadd.f32 %v668_v33, %v2576_v28  ;;  %v758_v57 = vadd.f32 %v757_v47, %v497_v42  ;;  %v788_v23 = vadd.f32 %v787_v12, %v526_v7  ;;  %v502_v33 = vld [vmem:[%s2308_s26 + $0x6a8] sm:$0xff]  ;;  %v529_v42 = vld [vmem:[%s2308_s26 + $0x780] sm:$0xff]  ;;  %v480_v12 = vld [vmem:[%s2308_s26 + $0x5f8] sm:$0xff] }
  0x8c   : > { %v731_v62 = vadd.f32 %v730_v50, %v471_v46  ;;  %v477_v47 = vld [vmem:[%s2308_s26 + $0x5e0] sm:$0xff]  ;;  %v530_v50 = vld [vmem:[%s2308_s26 + $0x788] sm:$0xff] }
  0x8d   : > { %v670_v55 = vadd.f32 %v669_v45, %v2583_v39  ;;  %v759_v5 = vadd.f32 %v758_v57, %v498_v52  ;;  %v789_v34 = vadd.f32 %v788_v23, %v527_v19  ;;  %v503_v45 = vld [vmem:[%s2308_s26 + $0x6b0] sm:$0xff]  ;;  %v534_v23 = vld [vmem:[%s2308_s26 + $0x7a8] sm:$0xff] }
  0x8e   : > { %v732_v9 = vadd.f32 %v731_v62, %v472_v56  ;;  %v478_v56 = vld [vmem:[%s2308_s26 + $0x5e8] sm:$0xff]  ;;  %v507_v19 = vld [vmem:[%s2308_s26 + $0x6d0] sm:$0xff] }
  0x8f   : > { %v671_v2 = vadd.f32 %v670_v55, %v2590_v49  ;;  %v760_v18 = vadd.f32 %v759_v5, %v499_v63  ;;  %v790_v46 = vadd.f32 %v789_v34, %v528_v31  ;;  %v505_v63 = vld [vmem:[%s2308_s26 + $0x6c0] sm:$0xff]  ;;  %v532_v5 = vld [vmem:[%s2308_s26 + $0x798] sm:$0xff] }
  0x90   : > { %v733_v21 = vadd.f32 %v732_v9, %v473_v4  ;;  %v506_v9 = vld [vmem:[%s2308_s26 + $0x6c8] sm:$0xff] }
  0x91   : > { %v672_v14 = vadd.f32 %v671_v2, %v2597_v60  ;;  %v761_v30 = vadd.f32 %v760_v18, %v500_v11  ;;  %v791_v55 = vadd.f32 %v790_v46, %v529_v42  ;;  %v479_v2 = vld [vmem:[%s2308_s26 + $0x5f0] sm:$0xff] }
  0x92   : > { %v734_v32 = vadd.f32 %v733_v21, %v474_v15  ;;  %v533_v15 = vld [vmem:[%s2308_s26 + $0x7a0] sm:$0xff]  ;;  %v511_v46 = vld [vmem:[%s2308_s26 + $0x6f0] sm:$0xff] }
  0x93   : > { %v673_v26 = vadd.f32 %v672_v14, %v2604_v8  ;;  %v762_v41 = vadd.f32 %v761_v30, %v501_v22  ;;  %v792_v0 = vadd.f32 %v791_v55, %v530_v50  ;;  %v538_v50 = vld [vmem:[%s2308_s26 + $0x7c8] sm:$0xff] }
  0x94   : > { %v735_v44 = vadd.f32 %v734_v32, %v475_v27  ;;  %v508_v27 = vld [vmem:[%s2308_s26 + $0x6d8] sm:$0xff]  ;;  %v535_v32 = vld [vmem:[%s2308_s26 + $0x7b0] sm:$0xff] }
  0x95   : > { %v674_v35 = vadd.f32 %v673_v26, %v2611_v20  ;;  %v763_v48 = vadd.f32 %v762_v41, %v502_v33  ;;  %v793_v11 = vadd.f32 %v792_v0, %v531_v59  ;;  %v509_v33 = vld [vmem:[%s2308_s26 + $0x6e0] sm:$0xff]  ;;  %v510_v41 = vld [vmem:[%s2308_s26 + $0x6e8] sm:$0xff] }
  0x96   : > { %v736_v52 = vadd.f32 %v735_v44, %v476_v37  ;;  %v536_v37 = vld [vmem:[%s2308_s26 + $0x7b8] sm:$0xff]  ;;  %v541_v0 = vld [vmem:[%s2308_s26 + $0x7e0] sm:$0xff] }
  0x97   : > { %675 = vadd.xlane.f32.xlu1 %v674_v35  ;;  %v764_v57 = vadd.f32 %v763_v48, %v503_v45  ;;  %v794_v21 = vadd.f32 %v793_v11, %v532_v5  ;;  %v537_v45 = vld [vmem:[%s2308_s26 + $0x7c0] sm:$0xff]  ;;  %v544_v11 = vld [vmem:[%s2308_s26 + $0x7f8] sm:$0xff] }
  0x98   : > { %v737_v62 = vadd.f32 %v736_v52, %v477_v47  ;;  %v512_v52 = vld [vmem:[%s2308_s26 + $0x6f8] sm:$0xff] }
  0x99   : > { %v765_v4 = vadd.f32 %v764_v57, %v504_v53  ;;  %v795_v30 = vadd.f32 %v794_v21, %v533_v15  ;;  %v824_v15 = vld [vmem:[%s3497_s1 + $0x38] sm:$0xff]  ;;  %v821_v21 = vld [vmem:[%s3497_s1 + $0x20] sm:$0xff] }
  0x9a   : > { %v738_v7 = vadd.f32 %v737_v62, %v478_v56  ;;  %v539_v56 = vld [vmem:[%s2308_s26 + $0x7d0] sm:$0xff]  ;;  %v540_v62 = vld [vmem:[%s2308_s26 + $0x7d8] sm:$0xff]  ;;  %876 = vmatpush.msra.mxu0 %v824_v15 }
  0x9b   : > { %v766_v14 = vadd.f32 %v765_v4, %v505_v63  ;;  %v796_v34 = vadd.f32 %v795_v30, %v534_v23  ;;  %v542_v4 = vld [vmem:[%s2308_s26 + $0x7e8] sm:$0xff]  ;;  %v817_v30 = vld [vmem:[%s3497_s1] sm:$0xff] }
  0x9c   : > { %v739_v18 = vadd.f32 %v738_v7, %v479_v2  ;;  %v543_v7 = vld [vmem:[%s2308_s26 + $0x7f0] sm:$0xff] }
  0x9d   : > { %v767_v22 = vadd.f32 %v766_v14, %v506_v9  ;;  %v797_v42 = vadd.f32 %v796_v34, %v535_v32  ;;  %v834_v32 = vlaneseq }
  0x9e   : > { %v740_v26 = vadd.f32 %v739_v18, %v480_v12  ;;  %v823_v18 = vld [vmem:[%s3497_s1 + $0x30] sm:$0xff] }
  0x9f   : > { %v768_v31 = vadd.f32 %v767_v22, %v507_v19  ;;  %v798_v47 = vadd.f32 %v797_v42, %v536_v37  ;;  %v822_v19 = vld [vmem:[%s3497_s1 + $0x28] sm:$0xff]  ;;  %877 = vmatpush.msra.mxu0 %v823_v18  ;;  %v820_v22 = vld [vmem:[%s3497_s1 + $0x18] sm:$0xff]  ;;  %v835_v34 = vand.u32 127, %v834_v32 }
  0xa0   : > { %741 = vadd.xlane.f32.xlu2 %v740_v26  ;;  %v819_v26 = vld [vmem:[%s3497_s1 + $0x10] sm:$0xff] }
  0xa1   : > { %v769_v35 = vadd.f32 %v768_v31, %v508_v27  ;;  %v799_v53 = vadd.f32 %v798_v47, %v537_v45  ;;  %878 = vmatpush.msra.mxu0 %v822_v19  ;;  %v818_v27 = vld [vmem:[%s3497_s1 + $0x8] sm:$0xff]  ;;  %v837_v37 = vadd.s32 4294967288, %v835_v34  ;;  %v861_v18 = vadd.s32 4294967240, %v835_v34 }
  0xa3   : > { %v770_v44 = vadd.f32 %v769_v35, %v509_v33  ;;  %v800_v57 = vadd.f32 %v799_v53, %v538_v50  ;;  %879 = vmatpush.msra.mxu0 %v821_v21  ;;  %v845_v50 = vadd.s32 4294967272, %v835_v34 }
  0xa5   : > { %v771_v48 = vadd.f32 %v770_v44, %v510_v41  ;;  %v801_v63 = vadd.f32 %v800_v57, %v539_v56  ;;  %880 = vmatpush.msra.mxu0 %v820_v22 }
  0xa7   : > { %v772_v55 = vadd.f32 %v771_v48, %v511_v46  ;;  %v802_v2 = vadd.f32 %v801_v63, %v540_v62  ;;  %881 = vmatpush.msra.mxu0 %v819_v26  ;;  %v841_v46 = vadd.s32 4294967280, %v835_v34  ;;  %v849_v62 = vadd.s32 4294967264, %v835_v34 }
  0xa9   : > { %v773_v59 = vadd.f32 %v772_v55, %v512_v52  ;;  %v803_v5 = vadd.f32 %v802_v2, %v541_v0  ;;  %882 = vmatpush.msra.mxu0 %v818_v27  ;;  %v853_v2 = vadd.s32 4294967256, %v835_v34 }
  0xab   : > { %774 = vadd.xlane.f32.xlu0 %v773_v59  ;;  %v804_v9 = vadd.f32 %v803_v5, %v542_v4  ;;  %883 = vmatpush.msra.mxu0 %v817_v30  ;;  %v857_v5 = vadd.s32 4294967248, %v835_v34  ;;  %v889_v30 = vld [vmem:[#allocation7] sm:$0xf] }
  0xac   : > { %1633 = vmatpush.msk.msra.mxu1 %vm895_vm8, %v889_v30  ;;  %v1740_v30 = vld [vmem:[%s2308_s26 + $0x20] sm:$0xff] }
  0xad   : > { %v805_v12 = vadd.f32 %v804_v9, %v543_v7 }
  0xaf   : > { %v806_v14 = vadd.f32 %v805_v12, %v544_v11 }
  0xb1   : > { %807 = vadd.xlane.f32.xlu1 %v806_v14 }
  0xe8   : > { %v577_v23 = vpop.xlane.xlu0 %576 }
  0xe9   : > { %v809_v42 = vmul.f32 0.00024414063, %v577_v23 }
  0xeb   : > { %v643_v31 = vpop.xlane.xlu1 %642  ;;  %v836_v48 = vperm.slane %v809_v42, %v835_v34  ;;  %v940_v34 = vshrl.u32 %v834_v32, 7 }
  0xec   : > { %v811_v47 = vmul.f32 0.00024414063, %v643_v31  ;;  %v825_v31 = vld [vmem:[#allocation5] sm:$0x1] }
  0xed   : > { %1723 = vset.pattern.permute.xlu2 %v940_v34  ;;  %v947_v42 = vadd.s32 8, %v940_v34 }
  0xee   : > { %v842_v55 = vperm.slane %v811_v47, %v841_v46 }
  0xef   : > { %1724 = vset.pattern.permute.xlu0 %v947_v42 }
  0xf3   : > { %v709_v35 = vpop.xlane.xlu2 %708 }
  0xf4   : > { %v813_v63 = vmul.f32 0.00024414063, %v709_v35 }
  0xf6   : > { %v850_v11 = vperm.slane %v813_v63, %v849_v62 }
  0xfc   : > { %v610_v33 = vpop.xlane.xlu0 %609 }
  0xfd   : > { %v810_v41 = vmul.f32 0.00024414063, %v610_v33 }
  0xff   : > { %v838_v45 = vperm.slane %v810_v41, %v837_v37  ;;  %v953_v41 = vadd.s32 16, %v940_v34 }
 0x101   : > { %v840_v53 = vsel %vm839_vm0, %v838_v45, %v836_v48  ;;  %1725 = vset.pattern.permute.xlu1 %v953_v41  ;;  %v1743_v41 = vld [vmem:[%s2308_s26 + $0x38] sm:$0xff] }
 0x102   : > { %v844_v0 = vsel %vm843_vm1, %v842_v55, %v840_v53 }
 0x10a   : > { %v676_v44 = vpop.xlane.xlu1 %675 }
 0x10b   : > { %v812_v52 = vmul.f32 0.00024414063, %v676_v44  ;;  %v890_v44 = vld [vmem:[#allocation8] sm:$0x1] }
 0x10d   : > { %v846_v57 = vperm.slane %v812_v52, %v845_v50 }
 0x10f   : > { %v848_v9 = vsel %vm847_vm2, %v846_v57, %v844_v0 }
 0x110   : > { %v852_v15 = vsel %vm851_vm3, %v850_v11, %v848_v9  ;;  %v983_v9 = vadd.s32 56, %v940_v34  ;;  %v965_v11 = vadd.s32 32, %v940_v34 }
 0x113   : > { %v742_v56 = vpop.xlane.xlu2 %741 }
 0x114   : > { %v814_v4 = vmul.f32 0.00024414063, %v742_v56 }
 0x116   : > { %v854_v12 = vperm.slane %v814_v4, %v853_v2 }
 0x118   : > { %v856_v22 = vsel %vm855_vm4, %v854_v12, %v852_v15  ;;  %v977_v12 = vadd.s32 48, %v940_v34  ;;  %v1736_v15 = vld [vmem:[%s2308_s26] sm:$0xff] }
 0x11e   : > { %v775_v59 = vpop.xlane.xlu0 %774 }
 0x11f   : > { %v815_v7 = vmul.f32 0.00024414063, %v775_v59 }
 0x121   : > { %v858_v14 = vperm.slane %v815_v7, %v857_v5  ;;  %v971_v5 = vadd.s32 40, %v940_v34  ;;  %v959_v7 = vadd.s32 24, %v940_v34 }
 0x123   : > { %v860_v23 = vsel %vm859_vm5, %v858_v14, %v856_v22  ;;  %v1738_v22 = vld [vmem:[%s2308_s26 + $0x10] sm:$0xff] }
 0x124   : > { %v808_v19 = vpop.xlane.xlu1 %807 }
 0x125   : > { %v816_v21 = vmul.f32 0.00024414063, %v808_v19  ;;  %v1737_v19 = vld [vmem:[%s2308_s26 + $0x8] sm:$0xff] }
 0x127   : > { %v862_v26 = vperm.slane %v816_v21, %v861_v18 }
 0x129   : > { %v864_v27 = vsel %vm863_vm6, %v862_v26, %v860_v23  ;;  %v1739_v26 = vld [vmem:[%s2308_s26 + $0x18] sm:$0xff] }
 0x12a   : > { %1632 = vmatmul.msk.f32.vlgmr.msra.gmra.mxu0 %vm865_vm7, %v864_v27 }
 0x1a7   : > { %v885_v33 = vpop.f32.mrf.mxu0 }
 0x1a8   : > { %v886_v35 = vadd.f32 %v885_v33, %v825_v31  ;;  %v1741_v33 = vld [vmem:[%s2308_s26 + $0x28] sm:$0xff] }
 0x1aa   : > { %v888_v37 = vmax.f32 %v886_v35, 0.0 }
 0x1ac   : > { %1634 = vmatmul.msk.f32.vlgmr.msra.gmra.mxu1 %vm891_vm9, %v888_v37  ;;  %v1742_v37 = vld [vmem:[%s2308_s26 + $0x30] sm:$0xff] }
 0x229   : > { %v916_v45 = vpop.f32.mrf.mxu1 }
 0x22a   : > { %v917_v46 = vadd.f32 %v916_v45, %v890_v44  ;;  %v1744_v44 = vld [vmem:[%s2308_s26 + $0x40] sm:$0xff] }
 0x22c   : > { %v919_v47 = vsub.f32 0.0, %v917_v46  ;;  %v1745_v46 = vld [vmem:[%s2308_s26 + $0x48] sm:$0xff] }
 0x22e   : > { %v920_v48 = vmul.f32 1.442695, %v919_v47 }
 0x230   : > { %1732 = vpow2.f32 %v920_v48  ;;  %v1746_v48 = vld [vmem:[%s2308_s26 + $0x50] sm:$0xff] }
 0x236   : > { %v1733_v50 = vpop.eup %1732 }
 0x237   : > { %v922_v52 = vadd.f32 1.0, %v1733_v50 }
 0x239   : > { %1734 = vrcp.f32 %v922_v52  ;;  %v934_v57 = vand.u32 2147483648, %v922_v52  ;;  %v932_v32 = vand.u32 2147483647, %v922_v52  ;;  %vm928_vm11 = vweird.f32 %v922_v52 }
 0x23b   : > { %v935_v63 = vor.u32 1.1754944e-38, %v934_v57  ;;  %vm933_vm13 = vcmp.eq.f32.partialorder %v932_v32, 8.507059e+37  ;;  %v1749_v57 = vld [vmem:[%s2308_s26 + $0x68] sm:$0xff]  ;;  %v1750_v32 = vld [vmem:[%s2308_s26 + $0x70] sm:$0xff] }
 0x23f   : > { %v1735_v53 = vpop.eup %1734 }
 0x240   : > { %v924_v55 = vmul.f32 %v1735_v53, %v922_v52  ;;  %vm929_vm10 = vweird.f32 %v1735_v53  ;;  %v1747_v52 = vld [vmem:[%s2308_s26 + $0x58] sm:$0xff] }
 0x241   : > { %vm930_vm12 = vmor %vm928_vm11, %vm929_vm10 }
 0x242   : > { %v925_v56 = vsub.f32 1.0, %v924_v55  ;;  %v1748_v55 = vld [vmem:[%s2308_s26 + $0x60] sm:$0xff] }
 0x244   : > { %v926_v59 = vmul.f32 %v1735_v53, %v925_v56 }
 0x246   : > { %v927_v62 = vadd.f32 %v1735_v53, %v926_v59 }
 0x248   : > { %v931_v0 = vsel %vm930_vm12, %v1735_v53, %v927_v62 }
 0x249   : > { %v936_v2 = vsel %vm933_vm13, %v935_v63, %v931_v0  ;;  %v1751_v63 = vld [vmem:[%s2308_s26 + $0x78] sm:$0xff] }
 0x24a   : > { %v938_v4 = vperm.slane %v936_v2, 0  ;;  %v1752_v2 = vld [vmem:[%s2308_s26 + $0x80] sm:$0xff] }
 0x24c   : > { %955 = vperm.xlu1 %1725, %v938_v4   ;;  %949 = vperm.xlu0 %1724, %v938_v4  }
 0x24d   : > { %943 = vperm.xlu2 %1723, %v938_v4  }
 0x254   : > { %1728 = vset.pattern.permute.xlu1 %v971_v5  ;;  %1731 = vset.pattern.permute.xlu0 %v983_v9  ;;  %v1753_v5 = vld [vmem:[%s2308_s26 + $0x88] sm:$0xff] }
 0x255   : > { %1726 = vset.pattern.permute.xlu2 %v959_v7 }
 0x25c   : > { %973 = vperm.xlu1 %1728, %v938_v4  }
 0x25d   : > { %961 = vperm.xlu2 %1726, %v938_v4  }
 0x264   : > { %1730 = vset.pattern.permute.xlu1 %v983_v9  ;;  %v1754_v9 = vld [vmem:[%s2308_s26 + $0x90] sm:$0xff] }
 0x265   : > { %1727 = vset.pattern.permute.xlu2 %v965_v11 }
 0x26c   : > { %985 = vperm.xlu1 %1730, %v938_v4  }
 0x26d   : > { %967 = vperm.xlu2 %1727, %v938_v4  }
 0x275   : > { %1729 = vset.pattern.permute.xlu2 %v977_v12  ;;  %v1755_v12 = vld [vmem:[%s2308_s26 + $0x98] sm:$0xff] }
 0x27d   : > { %979 = vperm.xlu2 %1729, %v938_v4  }
 0x2a7   : > { %v2674_v14 = vpop.permute.xlu2 %943 }
 0x2a8   : > { %v987_v18 = vmul.f32 %v1736_v15, %v2674_v14  ;;  %v988_v21 = vmul.f32 %v1737_v19, %v2674_v14  ;;  %v989_v23 = vmul.f32 %v1738_v22, %v2674_v14  ;;  %v990_v27 = vmul.f32 %v1739_v26, %v2674_v14 }
 0x2a9   : > { %v991_v31 = vmul.f32 %v1740_v30, %v2674_v14  ;;  %v992_v35 = vmul.f32 %v1741_v33, %v2674_v14  ;;  %v993_v34 = vmul.f32 %v1742_v37, %v2674_v14  ;;  %v994_v42 = vmul.f32 %v1743_v41, %v2674_v14 }
 0x2aa   : > { %1243 = vst [vmem:[%s2688_s13] sm:$0xff] %v987_v18  ;;  %v995_v45 = vmul.f32 %v1744_v44, %v2674_v14  ;;  %v996_v47 = vmul.f32 %v1745_v46, %v2674_v14  ;;  %v997_v50 = vmul.f32 %v1746_v48, %v2674_v14  ;;  %v998_v53 = vmul.f32 %v1747_v52, %v2674_v14  ;;  %v1756_v18 = vld [vmem:[%s2308_s26 + $0xa0] sm:$0xff] }
 0x2ab   : > { %1244 = vst [vmem:[%s2688_s13 + $0x8] sm:$0xff] %v988_v21  ;;  %v999_v56 = vmul.f32 %v1748_v55, %v2674_v14  ;;  %v1000_v59 = vmul.f32 %v1749_v57, %v2674_v14  ;;  %v1001_v62 = vmul.f32 %v1750_v32, %v2674_v14  ;;  %v1002_v0 = vmul.f32 %v1751_v63, %v2674_v14  ;;  %v1757_v21 = vld [vmem:[%s2308_s26 + $0xa8] sm:$0xff] }
 0x2ac   : > { %1245 = vst [vmem:[%s2688_s13 + $0x10] sm:$0xff] %v989_v23  ;;  %v1003_v4 = vmul.f32 %v1752_v2, %v2674_v14  ;;  %v1004_v7 = vmul.f32 %v1753_v5, %v2674_v14  ;;  %v1005_v11 = vmul.f32 %v1754_v9, %v2674_v14  ;;  %v1006_v15 = vmul.f32 %v1755_v12, %v2674_v14  ;;  %v1758_v23 = vld [vmem:[%s2308_s26 + $0xb0] sm:$0xff]  ;;  %v1766_v55 = vld [vmem:[%s2308_s26 + $0x308] sm:$0xff] }
 0x2ad   : > { %1246 = vst [vmem:[%s2688_s13 + $0x18] sm:$0xff] %v990_v27  ;;  %v1007_v19 = vmul.f32 %v1756_v18, %v2674_v14  ;;  %v1008_v22 = vmul.f32 %v1757_v21, %v2674_v14  ;;  %v1009_v26 = vmul.f32 %v1758_v23, %v2674_v14  ;;  %v1759_v27 = vld [vmem:[%s2308_s26 + $0xb8] sm:$0xff]  ;;  %v1018_v52 = vmul.f32 %v2674_v14, %v2437_v13 }
 0x2ae   : > { %1247 = vst [vmem:[%s2688_s13 + $0x20] sm:$0xff] %v991_v31  ;;  %v1010_v30 = vmul.f32 %v1759_v27, %v2674_v14  ;;  %v1760_v31 = vld [vmem:[%s2308_s26 + $0xc0] sm:$0xff]  ;;  %v1777_v27 = vld [vmem:[%s2308_s26 + $0x208] sm:$0xff] }
 0x2af   : > { %1248 = vst [vmem:[%s2688_s13 + $0x28] sm:$0xff] %v992_v35  ;;  %v1011_v33 = vmul.f32 %v1760_v31, %v2674_v14  ;;  %v1761_v35 = vld [vmem:[%s2308_s26 + $0xc8] sm:$0xff]  ;;  %v1779_v31 = vld [vmem:[%s2308_s26 + $0x218] sm:$0xff] }
 0x2b0   : > { %1249 = vst [vmem:[%s2688_s13 + $0x30] sm:$0xff] %v993_v34  ;;  %v1012_v37 = vmul.f32 %v1761_v35, %v2674_v14  ;;  %v1762_v34 = vld [vmem:[%s2308_s26 + $0xd0] sm:$0xff]  ;;  %v1780_v35 = vld [vmem:[%s2308_s26 + $0x220] sm:$0xff] }
 0x2b1   : > { %1250 = vst [vmem:[%s2688_s13 + $0x38] sm:$0xff] %v994_v42  ;;  %v1013_v41 = vmul.f32 %v1762_v34, %v2674_v14  ;;  %v1763_v42 = vld [vmem:[%s2308_s26 + $0xd8] sm:$0xff]  ;;  %v1781_v34 = vld [vmem:[%s2308_s26 + $0x228] sm:$0xff] }
 0x2b2   : > { %1251 = vst [vmem:[%s2688_s13 + $0x40] sm:$0xff] %v995_v45  ;;  %v1014_v44 = vmul.f32 %v1763_v42, %v2674_v14  ;;  %v1764_v45 = vld [vmem:[%s2308_s26 + $0xe0] sm:$0xff]  ;;  %v1782_v42 = vld [vmem:[%s2308_s26 + $0x230] sm:$0xff] }
 0x2b3   : > { %1252 = vst [vmem:[%s2688_s13 + $0x48] sm:$0xff] %v996_v47  ;;  %v1015_v46 = vmul.f32 %v1764_v45, %v2674_v14  ;;  %v1016_v47 = vmul.f32 %v2674_v14, %v2424_v58  ;;  %v1783_v45 = vld [vmem:[%s2308_s26 + $0x238] sm:$0xff] }
 0x2b4   : > { %1253 = vst [vmem:[%s2688_s13 + $0x50] sm:$0xff] %v997_v50  ;;  %v1017_v50 = vmul.f32 %v2674_v14, %v2432_v6  ;;  %v1767_v6 = vld [vmem:[%s2308_s26 + $0x310] sm:$0xff]  ;;  %v1768_v14 = vld [vmem:[%s2308_s26 + $0x318] sm:$0xff] }
 0x2b5   : > { %1254 = vst [vmem:[%s2688_s13 + $0x58] sm:$0xff] %v998_v53  ;;  %v1765_v53 = vld [vmem:[%s2308_s26 + $0x300] sm:$0xff] }
 0x2b6   : > { %1255 = vst [vmem:[%s2688_s13 + $0x60] sm:$0xff] %v999_v56 }
 0x2b7   : > { %1256 = vst [vmem:[%s2688_s13 + $0x68] sm:$0xff] %v1000_v59  ;;  %v2766_v48 = vpop.permute.xlu2 %961  ;;  %v1769_v59 = vld [vmem:[%s2308_s26 + $0x320] sm:$0xff] }
 0x2b8   : > { %1257 = vst [vmem:[%s2688_s13 + $0x70] sm:$0xff] %v1001_v62  ;;  %v1083_v58 = vmul.f32 %v1765_v53, %v2766_v48  ;;  %v1084_v56 = vmul.f32 %v1766_v55, %v2766_v48  ;;  %v1085_v13 = vmul.f32 %v1767_v6, %v2766_v48  ;;  %v1086_v57 = vmul.f32 %v1768_v14, %v2766_v48  ;;  %v1770_v62 = vld [vmem:[%s2308_s26 + $0x328] sm:$0xff]  ;;  %v1786_v53 = vld [vmem:[%s2308_s26 + $0x250] sm:$0xff]  ;;  %v1787_v55 = vld [vmem:[%s2308_s26 + $0x258] sm:$0xff] }
 0x2b9   : > { %1258 = vst [vmem:[%s2688_s13 + $0x78] sm:$0xff] %v1002_v0  ;;  %v1087_v32 = vmul.f32 %v1769_v59, %v2766_v48  ;;  %v1088_v63 = vmul.f32 %v1770_v62, %v2766_v48  ;;  %v1771_v0 = vld [vmem:[%s2308_s26 + $0x330] sm:$0xff]  ;;  %v1095_v21 = vmul.f32 %v2766_v48, %v2455_v36  ;;  %v1097_v23 = vmul.f32 %v2766_v48, %v2474_v61  ;;  %v1788_v6 = vld [vmem:[%s2308_s26 + $0x260] sm:$0xff]  ;;  %v1789_v14 = vld [vmem:[%s2308_s26 + $0x268] sm:$0xff] }
 0x2ba   : > { %1259 = vst [vmem:[%s2688_s13 + $0x80] sm:$0xff] %v1003_v4  ;;  %v1089_v2 = vmul.f32 %v1771_v0, %v2766_v48  ;;  %v1772_v4 = vld [vmem:[%s2308_s26 + $0x338] sm:$0xff]  ;;  %v1099_v36 = vmul.f32 %v2766_v48, %v2493_v25  ;;  %v1101_v61 = vmul.f32 %v2766_v48, %v2511_v51  ;;  %v1103_v25 = vmul.f32 %v2766_v48, %v2529_v16  ;;  %v1790_v59 = vld [vmem:[%s2308_s26 + $0x270] sm:$0xff]  ;;  %v1792_v0 = vld [vmem:[%s2308_s26 + $0x280] sm:$0xff] }
 0x2bb   : > { %1260 = vst [vmem:[%s2688_s13 + $0x88] sm:$0xff] %v1004_v7  ;;  %v1090_v5 = vmul.f32 %v1772_v4, %v2766_v48  ;;  %v1773_v7 = vld [vmem:[%s2308_s26 + $0x340] sm:$0xff]  ;;  %v1105_v51 = vmul.f32 %v2766_v48, %v2545_v43  ;;  %v1108_v16 = vmul.f32 %v2766_v48, %v2569_v17  ;;  %v1110_v43 = vmul.f32 %v2766_v48, %v2583_v39  ;;  %v1791_v62 = vld [vmem:[%s2308_s26 + $0x278] sm:$0xff]  ;;  %v1793_v4 = vld [vmem:[%s2308_s26 + $0x288] sm:$0xff] }
 0x2bc   : > { %1261 = vst [vmem:[%s2688_s13 + $0x90] sm:$0xff] %v1005_v11  ;;  %v1091_v9 = vmul.f32 %v1773_v7, %v2766_v48  ;;  %v1774_v11 = vld [vmem:[%s2308_s26 + $0x348] sm:$0xff]  ;;  %v1114_v39 = vmul.f32 %v2766_v48, %v2611_v20  ;;  %v1794_v7 = vld [vmem:[%s2308_s26 + $0x290] sm:$0xff] }
 0x2bd   : > { %1262 = vst [vmem:[%s2688_s13 + $0x98] sm:$0xff] %v1006_v15  ;;  %v1092_v12 = vmul.f32 %v1774_v11, %v2766_v48  ;;  %v1775_v15 = vld [vmem:[%s2308_s26 + $0x350] sm:$0xff]  ;;  %v1795_v11 = vld [vmem:[%s2308_s26 + $0x298] sm:$0xff] }
 0x2be   : > { %1263 = vst [vmem:[%s2688_s13 + $0xa0] sm:$0xff] %v1007_v19  ;;  %v1093_v18 = vmul.f32 %v1775_v15, %v2766_v48  ;;  %v1094_v19 = vmul.f32 %v2766_v48, %v2446_v24  ;;  %v1098_v24 = vmul.f32 %v2766_v48, %v2483_v10  ;;  %v1102_v10 = vmul.f32 %v2766_v48, %v2520_v1  ;;  %v2864_v17 = vpop.permute.xlu1 %955  ;;  %v1796_v15 = vld [vmem:[%s2308_s26 + $0x2a0] sm:$0xff] }
 0x2bf   : > { %1264 = vst [vmem:[%s2688_s13 + $0xa8] sm:$0xff] %v1008_v22  ;;  %v1096_v22 = vmul.f32 %v2766_v48, %v2459_v40  ;;  %v1100_v40 = vmul.f32 %v2766_v48, %v2502_v38  ;;  %v1104_v38 = vmul.f32 %v2766_v48, %v2537_v29  ;;  %v1107_v1 = vmul.f32 %v2766_v48, %v2561_v3 }
 0x2c0   : > { %1265 = vst [vmem:[%s2688_s13 + $0xb0] sm:$0xff] %v1009_v26  ;;  %v1106_v26 = vmul.f32 %v2766_v48, %v2553_v54  ;;  %v1109_v29 = vmul.f32 %v2766_v48, %v2576_v28  ;;  %v1111_v54 = vmul.f32 %v2766_v48, %v2590_v49  ;;  %v1112_v3 = vmul.f32 %v2766_v48, %v2597_v60  ;;  %v1776_v49 = vld [vmem:[%s2308_s26 + $0x200] sm:$0xff] }
 0x2c1   : > { %1266 = vst [vmem:[%s2688_s13 + $0xb8] sm:$0xff] %v1010_v30  ;;  %v1113_v28 = vmul.f32 %v2766_v48, %v2604_v8  ;;  %v1051_v60 = vmul.f32 %v1776_v49, %v2864_v17  ;;  %v1052_v30 = vmul.f32 %v1777_v27, %v2864_v17  ;;  %v1778_v8 = vld [vmem:[%s2308_s26 + $0x210] sm:$0xff]  ;;  %v1807_v49 = vld [vmem:[%s2308_s26 + $0x2f8] sm:$0xff]  ;;  %v1808_v27 = vld [vmem:[%s2308_s26 + $0x100] sm:$0xff] }
 0x2c2   : > { %1267 = vst [vmem:[%s2688_s13 + $0xc0] sm:$0xff] %v1011_v33  ;;  %v1053_v20 = vmul.f32 %v1778_v8, %v2864_v17  ;;  %v1054_v33 = vmul.f32 %v1779_v31, %v2864_v17  ;;  %v1809_v8 = vld [vmem:[%s2308_s26 + $0x108] sm:$0xff]  ;;  %v1810_v31 = vld [vmem:[%s2308_s26 + $0x110] sm:$0xff] }
 0x2c3   : > { %1268 = vst [vmem:[%s2688_s13 + $0xc8] sm:$0xff] %v1012_v37  ;;  %v1055_v37 = vmul.f32 %v1780_v35, %v2864_v17 }
 0x2c4   : > { %1269 = vst [vmem:[%s2688_s13 + $0xd0] sm:$0xff] %v1013_v41  ;;  %v1056_v41 = vmul.f32 %v1781_v34, %v2864_v17 }
 0x2c5   : > { %1270 = vst [vmem:[%s2688_s13 + $0xd8] sm:$0xff] %v1014_v44  ;;  %v1057_v44 = vmul.f32 %v1782_v42, %v2864_v17 }
 0x2c6   : > { %1271 = vst [vmem:[%s2688_s13 + $0xe0] sm:$0xff] %v1015_v46  ;;  %v1058_v46 = vmul.f32 %v1783_v45, %v2864_v17 }
 0x2c7   : > { %1272 = vst [vmem:[%s2688_s13 + $0xe8] sm:$0xff] %v1016_v47  ;;  %v1784_v47 = vld [vmem:[%s2308_s26 + $0x240] sm:$0xff] }
 0x2c8   : > { %1273 = vst [vmem:[%s2688_s13 + $0xf0] sm:$0xff] %v1017_v50  ;;  %v1059_v48 = vmul.f32 %v1784_v47, %v2864_v17  ;;  %v1785_v50 = vld [vmem:[%s2308_s26 + $0x248] sm:$0xff] }
 0x2c9   : > { %1274 = vst [vmem:[%s2688_s13 + $0xf8] sm:$0xff] %v1018_v52  ;;  %v1060_v52 = vmul.f32 %v1785_v50, %v2864_v17 }
 0x2ca   : > { %1339 = vst [vmem:[%s2688_s13 + $0x300] sm:$0xff] %v1083_v58  ;;  %v1061_v58 = vmul.f32 %v1786_v53, %v2864_v17 }
 0x2cb   : > { %1340 = vst [vmem:[%s2688_s13 + $0x308] sm:$0xff] %v1084_v56  ;;  %v1062_v56 = vmul.f32 %v1787_v55, %v2864_v17 }
 0x2cc   : > { %1341 = vst [vmem:[%s2688_s13 + $0x310] sm:$0xff] %v1085_v13  ;;  %v1063_v13 = vmul.f32 %v1788_v6, %v2864_v17 }
 0x2cd   : > { %1342 = vst [vmem:[%s2688_s13 + $0x318] sm:$0xff] %v1086_v57  ;;  %v1064_v57 = vmul.f32 %v1789_v14, %v2864_v17 }
 0x2ce   : > { %1343 = vst [vmem:[%s2688_s13 + $0x320] sm:$0xff] %v1087_v32  ;;  %v1065_v32 = vmul.f32 %v1790_v59, %v2864_v17 }
 0x2cf   : > { %1344 = vst [vmem:[%s2688_s13 + $0x328] sm:$0xff] %v1088_v63  ;;  %v1066_v63 = vmul.f32 %v1791_v62, %v2864_v17 }
 0x2d0   : > { %1345 = vst [vmem:[%s2688_s13 + $0x330] sm:$0xff] %v1089_v2  ;;  %v1067_v2 = vmul.f32 %v1792_v0, %v2864_v17 }
 0x2d1   : > { %1346 = vst [vmem:[%s2688_s13 + $0x338] sm:$0xff] %v1090_v5  ;;  %v1068_v5 = vmul.f32 %v1793_v4, %v2864_v17 }
 0x2d2   : > { %1347 = vst [vmem:[%s2688_s13 + $0x340] sm:$0xff] %v1091_v9  ;;  %v1069_v9 = vmul.f32 %v1794_v7, %v2864_v17 }
 0x2d3   : > { %1348 = vst [vmem:[%s2688_s13 + $0x348] sm:$0xff] %v1092_v12  ;;  %v1070_v12 = vmul.f32 %v1795_v11, %v2864_v17 }
 0x2d4   : > { %1349 = vst [vmem:[%s2688_s13 + $0x350] sm:$0xff] %v1093_v18  ;;  %v1071_v18 = vmul.f32 %v1796_v15, %v2864_v17 }
 0x2d5   : > { %1350 = vst [vmem:[%s2688_s13 + $0x358] sm:$0xff] %v1094_v19  ;;  %v1797_v19 = vld [vmem:[%s2308_s26 + $0x2a8] sm:$0xff] }
 0x2d6   : > { %1351 = vst [vmem:[%s2688_s13 + $0x360] sm:$0xff] %v1095_v21  ;;  %v1072_v21 = vmul.f32 %v1797_v19, %v2864_v17 }
 0x2d7   : > { %1352 = vst [vmem:[%s2688_s13 + $0x368] sm:$0xff] %v1096_v22  ;;  %v1798_v22 = vld [vmem:[%s2308_s26 + $0x2b0] sm:$0xff] }
 0x2d8   : > { %1353 = vst [vmem:[%s2688_s13 + $0x370] sm:$0xff] %v1097_v23  ;;  %v1073_v23 = vmul.f32 %v1798_v22, %v2864_v17 }
 0x2d9   : > { %1354 = vst [vmem:[%s2688_s13 + $0x378] sm:$0xff] %v1098_v24  ;;  %v1799_v24 = vld [vmem:[%s2308_s26 + $0x2b8] sm:$0xff] }
 0x2da   : > { %1355 = vst [vmem:[%s2688_s13 + $0x380] sm:$0xff] %v1099_v36  ;;  %v1074_v36 = vmul.f32 %v1799_v24, %v2864_v17 }
 0x2db   : > { %1356 = vst [vmem:[%s2688_s13 + $0x388] sm:$0xff] %v1100_v40  ;;  %v1800_v40 = vld [vmem:[%s2308_s26 + $0x2c0] sm:$0xff] }
 0x2dc   : > { %1357 = vst [vmem:[%s2688_s13 + $0x390] sm:$0xff] %v1101_v61  ;;  %v1075_v61 = vmul.f32 %v1800_v40, %v2864_v17 }
 0x2dd   : > { %1358 = vst [vmem:[%s2688_s13 + $0x398] sm:$0xff] %v1102_v10  ;;  %v1801_v10 = vld [vmem:[%s2308_s26 + $0x2c8] sm:$0xff] }
 0x2de   : > { %1359 = vst [vmem:[%s2688_s13 + $0x3a0] sm:$0xff] %v1103_v25  ;;  %v1076_v25 = vmul.f32 %v1801_v10, %v2864_v17 }
 0x2df   : > { %1360 = vst [vmem:[%s2688_s13 + $0x3a8] sm:$0xff] %v1104_v38  ;;  %v1802_v38 = vld [vmem:[%s2308_s26 + $0x2d0] sm:$0xff] }
 0x2e0   : > { %1361 = vst [vmem:[%s2688_s13 + $0x3b0] sm:$0xff] %v1105_v51  ;;  %v1077_v51 = vmul.f32 %v1802_v38, %v2864_v17 }
 0x2e1   : > { %1362 = vst [vmem:[%s2688_s13 + $0x3b8] sm:$0xff] %v1106_v26  ;;  %v1803_v26 = vld [vmem:[%s2308_s26 + $0x2d8] sm:$0xff] }
 0x2e2   : > { %1363 = vst [vmem:[%s2688_s13 + $0x3c0] sm:$0xff] %v1107_v1  ;;  %v1078_v1 = vmul.f32 %v1803_v26, %v2864_v17 }
 0x2e3   : > { %1364 = vst [vmem:[%s2688_s13 + $0x3c8] sm:$0xff] %v1108_v16  ;;  %v1804_v16 = vld [vmem:[%s2308_s26 + $0x2e0] sm:$0xff] }
 0x2e4   : > { %1365 = vst [vmem:[%s2688_s13 + $0x3d0] sm:$0xff] %v1109_v29  ;;  %v1079_v29 = vmul.f32 %v1804_v16, %v2864_v17 }
 0x2e5   : > { %1366 = vst [vmem:[%s2688_s13 + $0x3d8] sm:$0xff] %v1110_v43  ;;  %v1805_v43 = vld [vmem:[%s2308_s26 + $0x2e8] sm:$0xff] }
 0x2e6   : > { %1367 = vst [vmem:[%s2688_s13 + $0x3e0] sm:$0xff] %v1111_v54  ;;  %v1080_v54 = vmul.f32 %v1805_v43, %v2864_v17 }
 0x2e7   : > { %1368 = vst [vmem:[%s2688_s13 + $0x3e8] sm:$0xff] %v1112_v3  ;;  %v2962_v3 = vpop.permute.xlu0 %949 }
 0x2e8   : > { %1369 = vst [vmem:[%s2688_s13 + $0x3f0] sm:$0xff] %v1113_v28  ;;  %v1806_v28 = vld [vmem:[%s2308_s26 + $0x2f0] sm:$0xff] }
 0x2e9   : > { %1370 = vst [vmem:[%s2688_s13 + $0x3f8] sm:$0xff] %v1114_v39  ;;  %v1081_v39 = vmul.f32 %v1806_v28, %v2864_v17 }
 0x2ea   : > { %1307 = vst [vmem:[%s2688_s13 + $0x200] sm:$0xff] %v1051_v60  ;;  %v1082_v60 = vmul.f32 %v1807_v49, %v2864_v17  ;;  %v1021_v17 = vmul.f32 %v1810_v31, %v2962_v3  ;;  %v1838_v49 = vld [vmem:[%s2308_s26 + $0x1f0] sm:$0xff]  ;;  %v1841_v31 = vld [vmem:[%s2308_s26 + $0x408] sm:$0xff] }
 0x2eb   : > { %1308 = vst [vmem:[%s2688_s13 + $0x208] sm:$0xff] %v1052_v30  ;;  %v1019_v30 = vmul.f32 %v1808_v27, %v2962_v3  ;;  %v1839_v27 = vld [vmem:[%s2308_s26 + $0x1f8] sm:$0xff] }
 0x2ec   : > { %1309 = vst [vmem:[%s2688_s13 + $0x210] sm:$0xff] %v1053_v20  ;;  %v1020_v20 = vmul.f32 %v1809_v8, %v2962_v3  ;;  %v1840_v8 = vld [vmem:[%s2308_s26 + $0x400] sm:$0xff] }
 0x2ed   : > { %1310 = vst [vmem:[%s2688_s13 + $0x218] sm:$0xff] %v1054_v33  ;;  %v1811_v33 = vld [vmem:[%s2308_s26 + $0x118] sm:$0xff] }
 0x2ee   : > { %1311 = vst [vmem:[%s2688_s13 + $0x220] sm:$0xff] %v1055_v37  ;;  %v1022_v35 = vmul.f32 %v1811_v33, %v2962_v3  ;;  %v1812_v37 = vld [vmem:[%s2308_s26 + $0x120] sm:$0xff]  ;;  %v1842_v33 = vld [vmem:[%s2308_s26 + $0x410] sm:$0xff] }
 0x2ef   : > { %1312 = vst [vmem:[%s2688_s13 + $0x228] sm:$0xff] %v1056_v41  ;;  %v1023_v34 = vmul.f32 %v1812_v37, %v2962_v3  ;;  %v1813_v41 = vld [vmem:[%s2308_s26 + $0x128] sm:$0xff] }
 0x2f0   : > { %1313 = vst [vmem:[%s2688_s13 + $0x230] sm:$0xff] %v1057_v44  ;;  %v1024_v42 = vmul.f32 %v1813_v41, %v2962_v3  ;;  %v1814_v44 = vld [vmem:[%s2308_s26 + $0x130] sm:$0xff] }
 0x2f1   : > { %1314 = vst [vmem:[%s2688_s13 + $0x238] sm:$0xff] %v1058_v46  ;;  %v1025_v45 = vmul.f32 %v1814_v44, %v2962_v3  ;;  %v1815_v46 = vld [vmem:[%s2308_s26 + $0x138] sm:$0xff] }
 0x2f2   : > { %1315 = vst [vmem:[%s2688_s13 + $0x240] sm:$0xff] %v1059_v48  ;;  %v1026_v47 = vmul.f32 %v1815_v46, %v2962_v3  ;;  %v1816_v48 = vld [vmem:[%s2308_s26 + $0x140] sm:$0xff] }
 0x2f3   : > { %1316 = vst [vmem:[%s2688_s13 + $0x248] sm:$0xff] %v1060_v52  ;;  %v1027_v50 = vmul.f32 %v1816_v48, %v2962_v3  ;;  %v1817_v52 = vld [vmem:[%s2308_s26 + $0x148] sm:$0xff] }
 0x2f4   : > { %1317 = vst [vmem:[%s2688_s13 + $0x250] sm:$0xff] %v1061_v58  ;;  %v1028_v53 = vmul.f32 %v1817_v52, %v2962_v3  ;;  %v1818_v58 = vld [vmem:[%s2308_s26 + $0x150] sm:$0xff] }
 0x2f5   : > { %1318 = vst [vmem:[%s2688_s13 + $0x258] sm:$0xff] %v1062_v56  ;;  %v1029_v55 = vmul.f32 %v1818_v58, %v2962_v3  ;;  %v1819_v56 = vld [vmem:[%s2308_s26 + $0x158] sm:$0xff] }
 0x2f6   : > { %1319 = vst [vmem:[%s2688_s13 + $0x260] sm:$0xff] %v1063_v13  ;;  %v1030_v6 = vmul.f32 %v1819_v56, %v2962_v3  ;;  %v1820_v13 = vld [vmem:[%s2308_s26 + $0x160] sm:$0xff] }
 0x2f7   : > { %1320 = vst [vmem:[%s2688_s13 + $0x268] sm:$0xff] %v1064_v57  ;;  %v1031_v14 = vmul.f32 %v1820_v13, %v2962_v3  ;;  %v1821_v57 = vld [vmem:[%s2308_s26 + $0x168] sm:$0xff] }
 0x2f8   : > { %1321 = vst [vmem:[%s2688_s13 + $0x270] sm:$0xff] %v1065_v32  ;;  %v1032_v59 = vmul.f32 %v1821_v57, %v2962_v3  ;;  %v1822_v32 = vld [vmem:[%s2308_s26 + $0x170] sm:$0xff] }
 0x2f9   : > { %1322 = vst [vmem:[%s2688_s13 + $0x278] sm:$0xff] %v1066_v63  ;;  %v1033_v62 = vmul.f32 %v1822_v32, %v2962_v3  ;;  %v1823_v63 = vld [vmem:[%s2308_s26 + $0x178] sm:$0xff] }
 0x2fa   : > { %1323 = vst [vmem:[%s2688_s13 + $0x280] sm:$0xff] %v1067_v2  ;;  %v1034_v0 = vmul.f32 %v1823_v63, %v2962_v3  ;;  %v1824_v2 = vld [vmem:[%s2308_s26 + $0x180] sm:$0xff] }
 0x2fb   : > { %1324 = vst [vmem:[%s2688_s13 + $0x288] sm:$0xff] %v1068_v5  ;;  %v1035_v4 = vmul.f32 %v1824_v2, %v2962_v3  ;;  %v1825_v5 = vld [vmem:[%s2308_s26 + $0x188] sm:$0xff] }
 0x2fc   : > { %1325 = vst [vmem:[%s2688_s13 + $0x290] sm:$0xff] %v1069_v9  ;;  %v1036_v7 = vmul.f32 %v1825_v5, %v2962_v3  ;;  %v1826_v9 = vld [vmem:[%s2308_s26 + $0x190] sm:$0xff] }
 0x2fd   : > { %1326 = vst [vmem:[%s2688_s13 + $0x298] sm:$0xff] %v1070_v12  ;;  %v1037_v11 = vmul.f32 %v1826_v9, %v2962_v3  ;;  %v1827_v12 = vld [vmem:[%s2308_s26 + $0x198] sm:$0xff] }
 0x2fe   : > { %1327 = vst [vmem:[%s2688_s13 + $0x2a0] sm:$0xff] %v1071_v18  ;;  %v1038_v15 = vmul.f32 %v1827_v12, %v2962_v3  ;;  %v1828_v18 = vld [vmem:[%s2308_s26 + $0x1a0] sm:$0xff] }
 0x2ff   : > { %1328 = vst [vmem:[%s2688_s13 + $0x2a8] sm:$0xff] %v1072_v21  ;;  %v1039_v19 = vmul.f32 %v1828_v18, %v2962_v3  ;;  %v1829_v21 = vld [vmem:[%s2308_s26 + $0x1a8] sm:$0xff] }
 0x300   : > { %1329 = vst [vmem:[%s2688_s13 + $0x2b0] sm:$0xff] %v1073_v23  ;;  %v1040_v22 = vmul.f32 %v1829_v21, %v2962_v3  ;;  %v1830_v23 = vld [vmem:[%s2308_s26 + $0x1b0] sm:$0xff] }
 0x301   : > { %1330 = vst [vmem:[%s2688_s13 + $0x2b8] sm:$0xff] %v1074_v36  ;;  %v1041_v24 = vmul.f32 %v1830_v23, %v2962_v3  ;;  %v1831_v36 = vld [vmem:[%s2308_s26 + $0x1b8] sm:$0xff] }
 0x302   : > { %1331 = vst [vmem:[%s2688_s13 + $0x2c0] sm:$0xff] %v1075_v61  ;;  %v1042_v40 = vmul.f32 %v1831_v36, %v2962_v3  ;;  %v1832_v61 = vld [vmem:[%s2308_s26 + $0x1c0] sm:$0xff] }
 0x303   : > { %1332 = vst [vmem:[%s2688_s13 + $0x2c8] sm:$0xff] %v1076_v25  ;;  %v1043_v10 = vmul.f32 %v1832_v61, %v2962_v3  ;;  %v1833_v25 = vld [vmem:[%s2308_s26 + $0x1c8] sm:$0xff] }
 0x304   : > { %1333 = vst [vmem:[%s2688_s13 + $0x2d0] sm:$0xff] %v1077_v51  ;;  %v1044_v38 = vmul.f32 %v1833_v25, %v2962_v3  ;;  %v1834_v51 = vld [vmem:[%s2308_s26 + $0x1d0] sm:$0xff] }
 0x305   : > { %1334 = vst [vmem:[%s2688_s13 + $0x2d8] sm:$0xff] %v1078_v1  ;;  %v1045_v26 = vmul.f32 %v1834_v51, %v2962_v3  ;;  %v1835_v1 = vld [vmem:[%s2308_s26 + $0x1d8] sm:$0xff] }
 0x306   : > { %1335 = vst [vmem:[%s2688_s13 + $0x2e0] sm:$0xff] %v1079_v29  ;;  %v1046_v16 = vmul.f32 %v1835_v1, %v2962_v3  ;;  %v1836_v29 = vld [vmem:[%s2308_s26 + $0x1e0] sm:$0xff] }
 0x307   : > { %1336 = vst [vmem:[%s2688_s13 + $0x2e8] sm:$0xff] %v1080_v54  ;;  %v1047_v43 = vmul.f32 %v1836_v29, %v2962_v3  ;;  %v1837_v54 = vld [vmem:[%s2308_s26 + $0x1e8] sm:$0xff] }
 0x308   : > { %1337 = vst [vmem:[%s2688_s13 + $0x2f0] sm:$0xff] %v1081_v39  ;;  %v1048_v28 = vmul.f32 %v1837_v54, %v2962_v3  ;;  %v3060_v39 = vpop.permute.xlu2 %967 }
 0x309   : > { %1338 = vst [vmem:[%s2688_s13 + $0x2f8] sm:$0xff] %v1082_v60  ;;  %v1049_v60 = vmul.f32 %v1838_v49, %v2962_v3 }
 0x30a   : > { %1275 = vst [vmem:[%s2688_s13 + $0x100] sm:$0xff] %v1019_v30  ;;  %v1050_v30 = vmul.f32 %v1839_v27, %v2962_v3  ;;  %v1117_v3 = vmul.f32 %v1842_v33, %v3060_v39  ;;  %v1870_v27 = vld [vmem:[%s2308_s26 + $0x4f0] sm:$0xff]  ;;  %v1873_v33 = vld [vmem:[%s2308_s26 + $0x508] sm:$0xff] }
 0x30b   : > { %1276 = vst [vmem:[%s2688_s13 + $0x108] sm:$0xff] %v1020_v20  ;;  %v1115_v20 = vmul.f32 %v1840_v8, %v3060_v39  ;;  %v1871_v8 = vld [vmem:[%s2308_s26 + $0x4f8] sm:$0xff] }
 0x30c   : > { %1277 = vst [vmem:[%s2688_s13 + $0x110] sm:$0xff] %v1021_v17  ;;  %v1116_v17 = vmul.f32 %v1841_v31, %v3060_v39  ;;  %v1872_v31 = vld [vmem:[%s2308_s26 + $0x500] sm:$0xff] }
 0x30d   : > { %1278 = vst [vmem:[%s2688_s13 + $0x118] sm:$0xff] %v1022_v35  ;;  %v1843_v35 = vld [vmem:[%s2308_s26 + $0x418] sm:$0xff] }
 0x30e   : > { %1279 = vst [vmem:[%s2688_s13 + $0x120] sm:$0xff] %v1023_v34  ;;  %v1118_v37 = vmul.f32 %v1843_v35, %v3060_v39  ;;  %v1844_v34 = vld [vmem:[%s2308_s26 + $0x420] sm:$0xff]  ;;  %v1874_v35 = vld [vmem:[%s2308_s26 + $0x510] sm:$0xff] }
 0x30f   : > { %1280 = vst [vmem:[%s2688_s13 + $0x128] sm:$0xff] %v1024_v42  ;;  %v1119_v41 = vmul.f32 %v1844_v34, %v3060_v39  ;;  %v1845_v42 = vld [vmem:[%s2308_s26 + $0x428] sm:$0xff] }
 0x310   : > { %1281 = vst [vmem:[%s2688_s13 + $0x130] sm:$0xff] %v1025_v45  ;;  %v1120_v44 = vmul.f32 %v1845_v42, %v3060_v39  ;;  %v1846_v45 = vld [vmem:[%s2308_s26 + $0x430] sm:$0xff] }
 0x311   : > { %1282 = vst [vmem:[%s2688_s13 + $0x138] sm:$0xff] %v1026_v47  ;;  %v1121_v46 = vmul.f32 %v1846_v45, %v3060_v39  ;;  %v1847_v47 = vld [vmem:[%s2308_s26 + $0x438] sm:$0xff] }
 0x312   : > { %1283 = vst [vmem:[%s2688_s13 + $0x140] sm:$0xff] %v1027_v50  ;;  %v1122_v48 = vmul.f32 %v1847_v47, %v3060_v39  ;;  %v1848_v50 = vld [vmem:[%s2308_s26 + $0x440] sm:$0xff] }
 0x313   : > { %1284 = vst [vmem:[%s2688_s13 + $0x148] sm:$0xff] %v1028_v53  ;;  %v1123_v52 = vmul.f32 %v1848_v50, %v3060_v39  ;;  %v1849_v53 = vld [vmem:[%s2308_s26 + $0x448] sm:$0xff] }
 0x314   : > { %1285 = vst [vmem:[%s2688_s13 + $0x150] sm:$0xff] %v1029_v55  ;;  %v1124_v58 = vmul.f32 %v1849_v53, %v3060_v39  ;;  %v1850_v55 = vld [vmem:[%s2308_s26 + $0x450] sm:$0xff] }
 0x315   : > { %1286 = vst [vmem:[%s2688_s13 + $0x158] sm:$0xff] %v1030_v6  ;;  %v1125_v56 = vmul.f32 %v1850_v55, %v3060_v39  ;;  %v1851_v6 = vld [vmem:[%s2308_s26 + $0x458] sm:$0xff] }
 0x316   : > { %1287 = vst [vmem:[%s2688_s13 + $0x160] sm:$0xff] %v1031_v14  ;;  %v1126_v13 = vmul.f32 %v1851_v6, %v3060_v39  ;;  %v1852_v14 = vld [vmem:[%s2308_s26 + $0x460] sm:$0xff] }
 0x317   : > { %1288 = vst [vmem:[%s2688_s13 + $0x168] sm:$0xff] %v1032_v59  ;;  %v1127_v57 = vmul.f32 %v1852_v14, %v3060_v39  ;;  %v1853_v59 = vld [vmem:[%s2308_s26 + $0x468] sm:$0xff] }
 0x318   : > { %1289 = vst [vmem:[%s2688_s13 + $0x170] sm:$0xff] %v1033_v62  ;;  %v1128_v32 = vmul.f32 %v1853_v59, %v3060_v39  ;;  %v1854_v62 = vld [vmem:[%s2308_s26 + $0x470] sm:$0xff] }
 0x319   : > { %1290 = vst [vmem:[%s2688_s13 + $0x178] sm:$0xff] %v1034_v0  ;;  %v1129_v63 = vmul.f32 %v1854_v62, %v3060_v39  ;;  %v1855_v0 = vld [vmem:[%s2308_s26 + $0x478] sm:$0xff] }
 0x31a   : > { %1291 = vst [vmem:[%s2688_s13 + $0x180] sm:$0xff] %v1035_v4  ;;  %v1130_v2 = vmul.f32 %v1855_v0, %v3060_v39  ;;  %v1856_v4 = vld [vmem:[%s2308_s26 + $0x480] sm:$0xff] }
 0x31b   : > { %1292 = vst [vmem:[%s2688_s13 + $0x188] sm:$0xff] %v1036_v7  ;;  %v1131_v5 = vmul.f32 %v1856_v4, %v3060_v39  ;;  %v1857_v7 = vld [vmem:[%s2308_s26 + $0x488] sm:$0xff] }
 0x31c   : > { %1293 = vst [vmem:[%s2688_s13 + $0x190] sm:$0xff] %v1037_v11  ;;  %v1132_v9 = vmul.f32 %v1857_v7, %v3060_v39  ;;  %v1858_v11 = vld [vmem:[%s2308_s26 + $0x490] sm:$0xff] }
 0x31d   : > { %1294 = vst [vmem:[%s2688_s13 + $0x198] sm:$0xff] %v1038_v15  ;;  %v1133_v12 = vmul.f32 %v1858_v11, %v3060_v39  ;;  %v1859_v15 = vld [vmem:[%s2308_s26 + $0x498] sm:$0xff] }
 0x31e   : > { %1295 = vst [vmem:[%s2688_s13 + $0x1a0] sm:$0xff] %v1039_v19  ;;  %v1134_v18 = vmul.f32 %v1859_v15, %v3060_v39  ;;  %v1860_v19 = vld [vmem:[%s2308_s26 + $0x4a0] sm:$0xff] }
 0x31f   : > { %1296 = vst [vmem:[%s2688_s13 + $0x1a8] sm:$0xff] %v1040_v22  ;;  %v1135_v21 = vmul.f32 %v1860_v19, %v3060_v39  ;;  %v1861_v22 = vld [vmem:[%s2308_s26 + $0x4a8] sm:$0xff] }
 0x320   : > { %1297 = vst [vmem:[%s2688_s13 + $0x1b0] sm:$0xff] %v1041_v24  ;;  %v1136_v23 = vmul.f32 %v1861_v22, %v3060_v39  ;;  %v1862_v24 = vld [vmem:[%s2308_s26 + $0x4b0] sm:$0xff] }
 0x321   : > { %1298 = vst [vmem:[%s2688_s13 + $0x1b8] sm:$0xff] %v1042_v40  ;;  %v1137_v36 = vmul.f32 %v1862_v24, %v3060_v39  ;;  %v1863_v40 = vld [vmem:[%s2308_s26 + $0x4b8] sm:$0xff] }
 0x322   : > { %1299 = vst [vmem:[%s2688_s13 + $0x1c0] sm:$0xff] %v1043_v10  ;;  %v1138_v61 = vmul.f32 %v1863_v40, %v3060_v39  ;;  %v1864_v10 = vld [vmem:[%s2308_s26 + $0x4c0] sm:$0xff] }
 0x323   : > { %1300 = vst [vmem:[%s2688_s13 + $0x1c8] sm:$0xff] %v1044_v38  ;;  %v1139_v25 = vmul.f32 %v1864_v10, %v3060_v39  ;;  %v1865_v38 = vld [vmem:[%s2308_s26 + $0x4c8] sm:$0xff] }
 0x324   : > { %1301 = vst [vmem:[%s2688_s13 + $0x1d0] sm:$0xff] %v1045_v26  ;;  %v1140_v51 = vmul.f32 %v1865_v38, %v3060_v39  ;;  %v1866_v26 = vld [vmem:[%s2308_s26 + $0x4d0] sm:$0xff] }
 0x325   : > { %1302 = vst [vmem:[%s2688_s13 + $0x1d8] sm:$0xff] %v1046_v16  ;;  %v1141_v1 = vmul.f32 %v1866_v26, %v3060_v39  ;;  %v1867_v16 = vld [vmem:[%s2308_s26 + $0x4d8] sm:$0xff] }
 0x326   : > { %1303 = vst [vmem:[%s2688_s13 + $0x1e0] sm:$0xff] %v1047_v43  ;;  %v1142_v29 = vmul.f32 %v1867_v16, %v3060_v39  ;;  %v1868_v43 = vld [vmem:[%s2308_s26 + $0x4e0] sm:$0xff] }
 0x327   : > { %1304 = vst [vmem:[%s2688_s13 + $0x1e8] sm:$0xff] %v1048_v28  ;;  %v1143_v54 = vmul.f32 %v1868_v43, %v3060_v39  ;;  %v1869_v28 = vld [vmem:[%s2308_s26 + $0x4e8] sm:$0xff] }
 0x328   : > { %1305 = vst [vmem:[%s2688_s13 + $0x1f0] sm:$0xff] %v1049_v60  ;;  %v1144_v49 = vmul.f32 %v1869_v28, %v3060_v39  ;;  %v3158_v60 = vpop.permute.xlu1 %973 }
 0x329   : > { %1306 = vst [vmem:[%s2688_s13 + $0x1f8] sm:$0xff] %v1050_v30  ;;  %v1145_v30 = vmul.f32 %v1870_v27, %v3060_v39 }
 0x32a   : > { %1371 = vst [vmem:[%s2688_s13 + $0x400] sm:$0xff] %v1115_v20  ;;  %v1146_v20 = vmul.f32 %v1871_v8, %v3060_v39  ;;  %v1149_v39 = vmul.f32 %v1874_v35, %v3158_v60  ;;  %v1902_v8 = vld [vmem:[%s2308_s26 + $0x5f0] sm:$0xff]  ;;  %v1905_v35 = vld [vmem:[%s2308_s26 + $0x608] sm:$0xff] }
 0x32b   : > { %1372 = vst [vmem:[%s2688_s13 + $0x408] sm:$0xff] %v1116_v17  ;;  %v1147_v17 = vmul.f32 %v1872_v31, %v3158_v60  ;;  %v1903_v31 = vld [vmem:[%s2308_s26 + $0x5f8] sm:$0xff] }
 0x32c   : > { %1373 = vst [vmem:[%s2688_s13 + $0x410] sm:$0xff] %v1117_v3  ;;  %v1148_v3 = vmul.f32 %v1873_v33, %v3158_v60  ;;  %v1904_v33 = vld [vmem:[%s2308_s26 + $0x600] sm:$0xff] }
 0x32d   : > { %1374 = vst [vmem:[%s2688_s13 + $0x418] sm:$0xff] %v1118_v37  ;;  %v1875_v37 = vld [vmem:[%s2308_s26 + $0x518] sm:$0xff] }
 0x32e   : > { %1375 = vst [vmem:[%s2688_s13 + $0x420] sm:$0xff] %v1119_v41  ;;  %v1150_v34 = vmul.f32 %v1875_v37, %v3158_v60  ;;  %v1876_v41 = vld [vmem:[%s2308_s26 + $0x520] sm:$0xff]  ;;  %v1906_v37 = vld [vmem:[%s2308_s26 + $0x610] sm:$0xff] }
 0x32f   : > { %1376 = vst [vmem:[%s2688_s13 + $0x428] sm:$0xff] %v1120_v44  ;;  %v1151_v42 = vmul.f32 %v1876_v41, %v3158_v60  ;;  %v1877_v44 = vld [vmem:[%s2308_s26 + $0x528] sm:$0xff] }
 0x330   : > { %1377 = vst [vmem:[%s2688_s13 + $0x430] sm:$0xff] %v1121_v46  ;;  %v1152_v45 = vmul.f32 %v1877_v44, %v3158_v60  ;;  %v1878_v46 = vld [vmem:[%s2308_s26 + $0x530] sm:$0xff] }
 0x331   : > { %1378 = vst [vmem:[%s2688_s13 + $0x438] sm:$0xff] %v1122_v48  ;;  %v1153_v47 = vmul.f32 %v1878_v46, %v3158_v60  ;;  %v1879_v48 = vld [vmem:[%s2308_s26 + $0x538] sm:$0xff] }
 0x332   : > { %1379 = vst [vmem:[%s2688_s13 + $0x440] sm:$0xff] %v1123_v52  ;;  %v1154_v50 = vmul.f32 %v1879_v48, %v3158_v60  ;;  %v1880_v52 = vld [vmem:[%s2308_s26 + $0x540] sm:$0xff] }
 0x333   : > { %1380 = vst [vmem:[%s2688_s13 + $0x448] sm:$0xff] %v1124_v58  ;;  %v1155_v53 = vmul.f32 %v1880_v52, %v3158_v60  ;;  %v1881_v58 = vld [vmem:[%s2308_s26 + $0x548] sm:$0xff] }
 0x334   : > { %1381 = vst [vmem:[%s2688_s13 + $0x450] sm:$0xff] %v1125_v56  ;;  %v1156_v55 = vmul.f32 %v1881_v58, %v3158_v60  ;;  %v1882_v56 = vld [vmem:[%s2308_s26 + $0x550] sm:$0xff] }
 0x335   : > { %1382 = vst [vmem:[%s2688_s13 + $0x458] sm:$0xff] %v1126_v13  ;;  %v1157_v6 = vmul.f32 %v1882_v56, %v3158_v60  ;;  %v1883_v13 = vld [vmem:[%s2308_s26 + $0x558] sm:$0xff] }
 0x336   : > { %1383 = vst [vmem:[%s2688_s13 + $0x460] sm:$0xff] %v1127_v57  ;;  %v1158_v14 = vmul.f32 %v1883_v13, %v3158_v60  ;;  %v1884_v57 = vld [vmem:[%s2308_s26 + $0x560] sm:$0xff] }
 0x337   : > { %1384 = vst [vmem:[%s2688_s13 + $0x468] sm:$0xff] %v1128_v32  ;;  %v1159_v59 = vmul.f32 %v1884_v57, %v3158_v60  ;;  %v1885_v32 = vld [vmem:[%s2308_s26 + $0x568] sm:$0xff] }
 0x338   : > { %1385 = vst [vmem:[%s2688_s13 + $0x470] sm:$0xff] %v1129_v63  ;;  %v1160_v62 = vmul.f32 %v1885_v32, %v3158_v60  ;;  %v1886_v63 = vld [vmem:[%s2308_s26 + $0x570] sm:$0xff] }
 0x339   : > { %1386 = vst [vmem:[%s2688_s13 + $0x478] sm:$0xff] %v1130_v2  ;;  %v1161_v0 = vmul.f32 %v1886_v63, %v3158_v60  ;;  %v1887_v2 = vld [vmem:[%s2308_s26 + $0x578] sm:$0xff] }
 0x33a   : > { %1387 = vst [vmem:[%s2688_s13 + $0x480] sm:$0xff] %v1131_v5  ;;  %v1162_v4 = vmul.f32 %v1887_v2, %v3158_v60  ;;  %v1888_v5 = vld [vmem:[%s2308_s26 + $0x580] sm:$0xff] }
 0x33b   : > { %1388 = vst [vmem:[%s2688_s13 + $0x488] sm:$0xff] %v1132_v9  ;;  %v1163_v7 = vmul.f32 %v1888_v5, %v3158_v60  ;;  %v1889_v9 = vld [vmem:[%s2308_s26 + $0x588] sm:$0xff] }
 0x33c   : > { %1389 = vst [vmem:[%s2688_s13 + $0x490] sm:$0xff] %v1133_v12  ;;  %v1164_v11 = vmul.f32 %v1889_v9, %v3158_v60  ;;  %v1890_v12 = vld [vmem:[%s2308_s26 + $0x590] sm:$0xff] }
 0x33d   : > { %1390 = vst [vmem:[%s2688_s13 + $0x498] sm:$0xff] %v1134_v18  ;;  %v1165_v15 = vmul.f32 %v1890_v12, %v3158_v60  ;;  %v1891_v18 = vld [vmem:[%s2308_s26 + $0x598] sm:$0xff] }
 0x33e   : > { %1391 = vst [vmem:[%s2688_s13 + $0x4a0] sm:$0xff] %v1135_v21  ;;  %v1166_v19 = vmul.f32 %v1891_v18, %v3158_v60  ;;  %v1892_v21 = vld [vmem:[%s2308_s26 + $0x5a0] sm:$0xff] }
 0x33f   : > { %1392 = vst [vmem:[%s2688_s13 + $0x4a8] sm:$0xff] %v1136_v23  ;;  %v1167_v22 = vmul.f32 %v1892_v21, %v3158_v60  ;;  %v1893_v23 = vld [vmem:[%s2308_s26 + $0x5a8] sm:$0xff] }
 0x340   : > { %1393 = vst [vmem:[%s2688_s13 + $0x4b0] sm:$0xff] %v1137_v36  ;;  %v1168_v24 = vmul.f32 %v1893_v23, %v3158_v60  ;;  %v1894_v36 = vld [vmem:[%s2308_s26 + $0x5b0] sm:$0xff] }
 0x341   : > { %1394 = vst [vmem:[%s2688_s13 + $0x4b8] sm:$0xff] %v1138_v61  ;;  %v1169_v40 = vmul.f32 %v1894_v36, %v3158_v60  ;;  %v1895_v61 = vld [vmem:[%s2308_s26 + $0x5b8] sm:$0xff] }
 0x342   : > { %1395 = vst [vmem:[%s2688_s13 + $0x4c0] sm:$0xff] %v1139_v25  ;;  %v1170_v10 = vmul.f32 %v1895_v61, %v3158_v60  ;;  %v1896_v25 = vld [vmem:[%s2308_s26 + $0x5c0] sm:$0xff] }
 0x343   : > { %1396 = vst [vmem:[%s2688_s13 + $0x4c8] sm:$0xff] %v1140_v51  ;;  %v1171_v38 = vmul.f32 %v1896_v25, %v3158_v60  ;;  %v1897_v51 = vld [vmem:[%s2308_s26 + $0x5c8] sm:$0xff] }
 0x344   : > { %1397 = vst [vmem:[%s2688_s13 + $0x4d0] sm:$0xff] %v1141_v1  ;;  %v1172_v26 = vmul.f32 %v1897_v51, %v3158_v60  ;;  %v1898_v1 = vld [vmem:[%s2308_s26 + $0x5d0] sm:$0xff] }
 0x345   : > { %1398 = vst [vmem:[%s2688_s13 + $0x4d8] sm:$0xff] %v1142_v29  ;;  %v1173_v16 = vmul.f32 %v1898_v1, %v3158_v60  ;;  %v1899_v29 = vld [vmem:[%s2308_s26 + $0x5d8] sm:$0xff] }
 0x346   : > { %1399 = vst [vmem:[%s2688_s13 + $0x4e0] sm:$0xff] %v1143_v54  ;;  %v1174_v43 = vmul.f32 %v1899_v29, %v3158_v60  ;;  %v1900_v54 = vld [vmem:[%s2308_s26 + $0x5e0] sm:$0xff] }
 0x347   : > { %1400 = vst [vmem:[%s2688_s13 + $0x4e8] sm:$0xff] %v1144_v49  ;;  %v1175_v28 = vmul.f32 %v1900_v54, %v3158_v60  ;;  %v1901_v49 = vld [vmem:[%s2308_s26 + $0x5e8] sm:$0xff] }
 0x348   : > { %1401 = vst [vmem:[%s2688_s13 + $0x4f0] sm:$0xff] %v1145_v30  ;;  %v1176_v27 = vmul.f32 %v1901_v49, %v3158_v60  ;;  %v3256_v30 = vpop.permute.xlu2 %979 }
 0x349   : > { %1402 = vst [vmem:[%s2688_s13 + $0x4f8] sm:$0xff] %v1146_v20  ;;  %v1177_v20 = vmul.f32 %v1902_v8, %v3158_v60 }
 0x34a   : > { %1403 = vst [vmem:[%s2688_s13 + $0x500] sm:$0xff] %v1147_v17  ;;  %v1178_v17 = vmul.f32 %v1903_v31, %v3158_v60  ;;  %v1181_v60 = vmul.f32 %v1906_v37, %v3256_v30  ;;  %v1934_v31 = vld [vmem:[%s2308_s26 + $0x6f0] sm:$0xff]  ;;  %v1937_v37 = vld [vmem:[%s2308_s26 + $0x708] sm:$0xff] }
 0x34b   : > { %1404 = vst [vmem:[%s2688_s13 + $0x508] sm:$0xff] %v1148_v3  ;;  %v1179_v3 = vmul.f32 %v1904_v33, %v3256_v30  ;;  %v1935_v33 = vld [vmem:[%s2308_s26 + $0x6f8] sm:$0xff] }
 0x34c   : > { %1405 = vst [vmem:[%s2688_s13 + $0x510] sm:$0xff] %v1149_v39  ;;  %v1180_v39 = vmul.f32 %v1905_v35, %v3256_v30  ;;  %v1936_v35 = vld [vmem:[%s2308_s26 + $0x700] sm:$0xff] }
 0x34d   : > { %1406 = vst [vmem:[%s2688_s13 + $0x518] sm:$0xff] %v1150_v34  ;;  %v1907_v34 = vld [vmem:[%s2308_s26 + $0x618] sm:$0xff] }
 0x34e   : > { %1407 = vst [vmem:[%s2688_s13 + $0x520] sm:$0xff] %v1151_v42  ;;  %v1182_v41 = vmul.f32 %v1907_v34, %v3256_v30  ;;  %v1908_v42 = vld [vmem:[%s2308_s26 + $0x620] sm:$0xff]  ;;  %v1938_v34 = vld [vmem:[%s2308_s26 + $0x710] sm:$0xff] }
 0x34f   : > { %1408 = vst [vmem:[%s2688_s13 + $0x528] sm:$0xff] %v1152_v45  ;;  %v1183_v44 = vmul.f32 %v1908_v42, %v3256_v30  ;;  %v1909_v45 = vld [vmem:[%s2308_s26 + $0x628] sm:$0xff] }
 0x350   : > { %1409 = vst [vmem:[%s2688_s13 + $0x530] sm:$0xff] %v1153_v47  ;;  %v1184_v46 = vmul.f32 %v1909_v45, %v3256_v30  ;;  %v1910_v47 = vld [vmem:[%s2308_s26 + $0x630] sm:$0xff] }
 0x351   : > { %1410 = vst [vmem:[%s2688_s13 + $0x538] sm:$0xff] %v1154_v50  ;;  %v1185_v48 = vmul.f32 %v1910_v47, %v3256_v30  ;;  %v1911_v50 = vld [vmem:[%s2308_s26 + $0x638] sm:$0xff] }
 0x352   : > { %1411 = vst [vmem:[%s2688_s13 + $0x540] sm:$0xff] %v1155_v53  ;;  %v1186_v52 = vmul.f32 %v1911_v50, %v3256_v30  ;;  %v1912_v53 = vld [vmem:[%s2308_s26 + $0x640] sm:$0xff] }
 0x353   : > { %1412 = vst [vmem:[%s2688_s13 + $0x548] sm:$0xff] %v1156_v55  ;;  %v1187_v58 = vmul.f32 %v1912_v53, %v3256_v30  ;;  %v1913_v55 = vld [vmem:[%s2308_s26 + $0x648] sm:$0xff] }
 0x354   : > { %1413 = vst [vmem:[%s2688_s13 + $0x550] sm:$0xff] %v1157_v6  ;;  %v1188_v56 = vmul.f32 %v1913_v55, %v3256_v30  ;;  %v1914_v6 = vld [vmem:[%s2308_s26 + $0x650] sm:$0xff] }
 0x355   : > { %1414 = vst [vmem:[%s2688_s13 + $0x558] sm:$0xff] %v1158_v14  ;;  %v1189_v13 = vmul.f32 %v1914_v6, %v3256_v30  ;;  %v1915_v14 = vld [vmem:[%s2308_s26 + $0x658] sm:$0xff] }
 0x356   : > { %1415 = vst [vmem:[%s2688_s13 + $0x560] sm:$0xff] %v1159_v59  ;;  %v1190_v57 = vmul.f32 %v1915_v14, %v3256_v30  ;;  %v1916_v59 = vld [vmem:[%s2308_s26 + $0x660] sm:$0xff] }
 0x357   : > { %1416 = vst [vmem:[%s2688_s13 + $0x568] sm:$0xff] %v1160_v62  ;;  %v1191_v32 = vmul.f32 %v1916_v59, %v3256_v30  ;;  %v1917_v62 = vld [vmem:[%s2308_s26 + $0x668] sm:$0xff] }
 0x358   : > { %1417 = vst [vmem:[%s2688_s13 + $0x570] sm:$0xff] %v1161_v0  ;;  %v1192_v63 = vmul.f32 %v1917_v62, %v3256_v30  ;;  %v1918_v0 = vld [vmem:[%s2308_s26 + $0x670] sm:$0xff] }
 0x359   : > { %1418 = vst [vmem:[%s2688_s13 + $0x578] sm:$0xff] %v1162_v4  ;;  %v1193_v2 = vmul.f32 %v1918_v0, %v3256_v30  ;;  %v1919_v4 = vld [vmem:[%s2308_s26 + $0x678] sm:$0xff] }
 0x35a   : > { %1419 = vst [vmem:[%s2688_s13 + $0x580] sm:$0xff] %v1163_v7  ;;  %v1194_v5 = vmul.f32 %v1919_v4, %v3256_v30  ;;  %v1920_v7 = vld [vmem:[%s2308_s26 + $0x680] sm:$0xff] }
 0x35b   : > { %1420 = vst [vmem:[%s2688_s13 + $0x588] sm:$0xff] %v1164_v11  ;;  %v1195_v9 = vmul.f32 %v1920_v7, %v3256_v30  ;;  %v1921_v11 = vld [vmem:[%s2308_s26 + $0x688] sm:$0xff] }
 0x35c   : > { %1421 = vst [vmem:[%s2688_s13 + $0x590] sm:$0xff] %v1165_v15  ;;  %v1196_v12 = vmul.f32 %v1921_v11, %v3256_v30  ;;  %v1922_v15 = vld [vmem:[%s2308_s26 + $0x690] sm:$0xff] }
 0x35d   : > { %1422 = vst [vmem:[%s2688_s13 + $0x598] sm:$0xff] %v1166_v19  ;;  %v1197_v18 = vmul.f32 %v1922_v15, %v3256_v30  ;;  %v1923_v19 = vld [vmem:[%s2308_s26 + $0x698] sm:$0xff] }
 0x35e   : > { %1423 = vst [vmem:[%s2688_s13 + $0x5a0] sm:$0xff] %v1167_v22  ;;  %v1198_v21 = vmul.f32 %v1923_v19, %v3256_v30  ;;  %v1924_v22 = vld [vmem:[%s2308_s26 + $0x6a0] sm:$0xff] }
 0x35f   : > { %1424 = vst [vmem:[%s2688_s13 + $0x5a8] sm:$0xff] %v1168_v24  ;;  %v1199_v23 = vmul.f32 %v1924_v22, %v3256_v30  ;;  %v1925_v24 = vld [vmem:[%s2308_s26 + $0x6a8] sm:$0xff] }
 0x360   : > { %1425 = vst [vmem:[%s2688_s13 + $0x5b0] sm:$0xff] %v1169_v40  ;;  %v1200_v36 = vmul.f32 %v1925_v24, %v3256_v30  ;;  %v1926_v40 = vld [vmem:[%s2308_s26 + $0x6b0] sm:$0xff] }
 0x361   : > { %1426 = vst [vmem:[%s2688_s13 + $0x5b8] sm:$0xff] %v1170_v10  ;;  %v1201_v61 = vmul.f32 %v1926_v40, %v3256_v30  ;;  %v1927_v10 = vld [vmem:[%s2308_s26 + $0x6b8] sm:$0xff] }
 0x362   : > { %1427 = vst [vmem:[%s2688_s13 + $0x5c0] sm:$0xff] %v1171_v38  ;;  %v1202_v25 = vmul.f32 %v1927_v10, %v3256_v30  ;;  %v1928_v38 = vld [vmem:[%s2308_s26 + $0x6c0] sm:$0xff] }
 0x363   : > { %1428 = vst [vmem:[%s2688_s13 + $0x5c8] sm:$0xff] %v1172_v26  ;;  %v1203_v51 = vmul.f32 %v1928_v38, %v3256_v30  ;;  %v1929_v26 = vld [vmem:[%s2308_s26 + $0x6c8] sm:$0xff] }
 0x364   : > { %1429 = vst [vmem:[%s2688_s13 + $0x5d0] sm:$0xff] %v1173_v16  ;;  %v1204_v1 = vmul.f32 %v1929_v26, %v3256_v30  ;;  %v1930_v16 = vld [vmem:[%s2308_s26 + $0x6d0] sm:$0xff] }
 0x365   : > { %1430 = vst [vmem:[%s2688_s13 + $0x5d8] sm:$0xff] %v1174_v43  ;;  %v1205_v29 = vmul.f32 %v1930_v16, %v3256_v30  ;;  %v1931_v43 = vld [vmem:[%s2308_s26 + $0x6d8] sm:$0xff] }
 0x366   : > { %1431 = vst [vmem:[%s2688_s13 + $0x5e0] sm:$0xff] %v1175_v28  ;;  %v1206_v54 = vmul.f32 %v1931_v43, %v3256_v30  ;;  %v1932_v28 = vld [vmem:[%s2308_s26 + $0x6e0] sm:$0xff] }
 0x367   : > { %1432 = vst [vmem:[%s2688_s13 + $0x5e8] sm:$0xff] %v1176_v27  ;;  %v1207_v49 = vmul.f32 %v1932_v28, %v3256_v30  ;;  %v1933_v27 = vld [vmem:[%s2308_s26 + $0x6e8] sm:$0xff] }
 0x368   : > { %1433 = vst [vmem:[%s2688_s13 + $0x5f0] sm:$0xff] %v1177_v20  ;;  %v1208_v8 = vmul.f32 %v1933_v27, %v3256_v30  ;;  %v3354_v20 = vpop.permute.xlu1 %985 }
 0x369   : > { %1434 = vst [vmem:[%s2688_s13 + $0x5f8] sm:$0xff] %v1178_v17  ;;  %v1209_v17 = vmul.f32 %v1934_v31, %v3256_v30 }
 0x36a   : > { %1435 = vst [vmem:[%s2688_s13 + $0x600] sm:$0xff] %v1179_v3  ;;  %v1210_v3 = vmul.f32 %v1935_v33, %v3256_v30  ;;  %v1213_v30 = vmul.f32 %v1938_v34, %v3354_v20 }
 0x36b   : > { %1436 = vst [vmem:[%s2688_s13 + $0x608] sm:$0xff] %v1180_v39  ;;  %v1211_v39 = vmul.f32 %v1936_v35, %v3354_v20 }
 0x36c   : > { %1437 = vst [vmem:[%s2688_s13 + $0x610] sm:$0xff] %v1181_v60  ;;  %v1212_v60 = vmul.f32 %v1937_v37, %v3354_v20 }
 0x36d   : > { %1438 = vst [vmem:[%s2688_s13 + $0x618] sm:$0xff] %v1182_v41  ;;  %v1939_v41 = vld [vmem:[%s2308_s26 + $0x718] sm:$0xff] }
 0x36e   : > { %1439 = vst [vmem:[%s2688_s13 + $0x620] sm:$0xff] %v1183_v44  ;;  %v1214_v42 = vmul.f32 %v1939_v41, %v3354_v20  ;;  %v1940_v44 = vld [vmem:[%s2308_s26 + $0x720] sm:$0xff] }
 0x36f   : > { %1440 = vst [vmem:[%s2688_s13 + $0x628] sm:$0xff] %v1184_v46  ;;  %v1215_v45 = vmul.f32 %v1940_v44, %v3354_v20  ;;  %v1941_v46 = vld [vmem:[%s2308_s26 + $0x728] sm:$0xff] }
 0x370   : > { %1441 = vst [vmem:[%s2688_s13 + $0x630] sm:$0xff] %v1185_v48  ;;  %v1216_v47 = vmul.f32 %v1941_v46, %v3354_v20  ;;  %v1942_v48 = vld [vmem:[%s2308_s26 + $0x730] sm:$0xff] }
 0x371   : > { %1442 = vst [vmem:[%s2688_s13 + $0x638] sm:$0xff] %v1186_v52  ;;  %v1217_v50 = vmul.f32 %v1942_v48, %v3354_v20  ;;  %v1943_v52 = vld [vmem:[%s2308_s26 + $0x738] sm:$0xff] }
 0x372   : > { %1443 = vst [vmem:[%s2688_s13 + $0x640] sm:$0xff] %v1187_v58  ;;  %v1218_v53 = vmul.f32 %v1943_v52, %v3354_v20  ;;  %v1944_v58 = vld [vmem:[%s2308_s26 + $0x740] sm:$0xff] }
 0x373   : > { %1444 = vst [vmem:[%s2688_s13 + $0x648] sm:$0xff] %v1188_v56  ;;  %v1219_v55 = vmul.f32 %v1944_v58, %v3354_v20  ;;  %v1945_v56 = vld [vmem:[%s2308_s26 + $0x748] sm:$0xff] }
 0x374   : > { %1445 = vst [vmem:[%s2688_s13 + $0x650] sm:$0xff] %v1189_v13  ;;  %v1220_v6 = vmul.f32 %v1945_v56, %v3354_v20  ;;  %v1946_v13 = vld [vmem:[%s2308_s26 + $0x750] sm:$0xff] }
 0x375   : > { %1446 = vst [vmem:[%s2688_s13 + $0x658] sm:$0xff] %v1190_v57  ;;  %v1221_v14 = vmul.f32 %v1946_v13, %v3354_v20  ;;  %v1947_v57 = vld [vmem:[%s2308_s26 + $0x758] sm:$0xff] }
 0x376   : > { %1447 = vst [vmem:[%s2688_s13 + $0x660] sm:$0xff] %v1191_v32  ;;  %v1222_v59 = vmul.f32 %v1947_v57, %v3354_v20  ;;  %v1948_v32 = vld [vmem:[%s2308_s26 + $0x760] sm:$0xff] }
 0x377   : > { %1448 = vst [vmem:[%s2688_s13 + $0x668] sm:$0xff] %v1192_v63  ;;  %v1223_v62 = vmul.f32 %v1948_v32, %v3354_v20  ;;  %v1949_v63 = vld [vmem:[%s2308_s26 + $0x768] sm:$0xff] }
 0x378   : > { %1449 = vst [vmem:[%s2688_s13 + $0x670] sm:$0xff] %v1193_v2  ;;  %v1224_v0 = vmul.f32 %v1949_v63, %v3354_v20  ;;  %v1950_v2 = vld [vmem:[%s2308_s26 + $0x770] sm:$0xff] }
 0x379   : > { %1450 = vst [vmem:[%s2688_s13 + $0x678] sm:$0xff] %v1194_v5  ;;  %v1225_v4 = vmul.f32 %v1950_v2, %v3354_v20  ;;  %v1951_v5 = vld [vmem:[%s2308_s26 + $0x778] sm:$0xff] }
 0x37a   : > { %1451 = vst [vmem:[%s2688_s13 + $0x680] sm:$0xff] %v1195_v9  ;;  %v1226_v7 = vmul.f32 %v1951_v5, %v3354_v20  ;;  %v1952_v9 = vld [vmem:[%s2308_s26 + $0x780] sm:$0xff] }
 0x37b   : > { %1452 = vst [vmem:[%s2688_s13 + $0x688] sm:$0xff] %v1196_v12  ;;  %v1227_v11 = vmul.f32 %v1952_v9, %v3354_v20  ;;  %v1953_v12 = vld [vmem:[%s2308_s26 + $0x788] sm:$0xff] }
 0x37c   : > { %1453 = vst [vmem:[%s2688_s13 + $0x690] sm:$0xff] %v1197_v18  ;;  %v1228_v15 = vmul.f32 %v1953_v12, %v3354_v20  ;;  %v1954_v18 = vld [vmem:[%s2308_s26 + $0x790] sm:$0xff] }
 0x37d   : > { %1454 = vst [vmem:[%s2688_s13 + $0x698] sm:$0xff] %v1198_v21  ;;  %v1229_v19 = vmul.f32 %v1954_v18, %v3354_v20  ;;  %v1955_v21 = vld [vmem:[%s2308_s26 + $0x798] sm:$0xff] }
 0x37e   : > { %1455 = vst [vmem:[%s2688_s13 + $0x6a0] sm:$0xff] %v1199_v23  ;;  %v1230_v22 = vmul.f32 %v1955_v21, %v3354_v20  ;;  %v1956_v23 = vld [vmem:[%s2308_s26 + $0x7a0] sm:$0xff] }
 0x37f   : > { %1456 = vst [vmem:[%s2688_s13 + $0x6a8] sm:$0xff] %v1200_v36  ;;  %v1231_v24 = vmul.f32 %v1956_v23, %v3354_v20  ;;  %v1957_v36 = vld [vmem:[%s2308_s26 + $0x7a8] sm:$0xff] }
 0x380   : > { %1457 = vst [vmem:[%s2688_s13 + $0x6b0] sm:$0xff] %v1201_v61  ;;  %v1232_v40 = vmul.f32 %v1957_v36, %v3354_v20  ;;  %v1958_v61 = vld [vmem:[%s2308_s26 + $0x7b0] sm:$0xff] }
 0x381   : > { %1458 = vst [vmem:[%s2688_s13 + $0x6b8] sm:$0xff] %v1202_v25  ;;  %v1233_v10 = vmul.f32 %v1958_v61, %v3354_v20  ;;  %v1959_v25 = vld [vmem:[%s2308_s26 + $0x7b8] sm:$0xff] }
 0x382   : > { %1459 = vst [vmem:[%s2688_s13 + $0x6c0] sm:$0xff] %v1203_v51  ;;  %v1234_v38 = vmul.f32 %v1959_v25, %v3354_v20  ;;  %v1960_v51 = vld [vmem:[%s2308_s26 + $0x7c0] sm:$0xff] }
 0x383   : > { %1460 = vst [vmem:[%s2688_s13 + $0x6c8] sm:$0xff] %v1204_v1  ;;  %v1235_v26 = vmul.f32 %v1960_v51, %v3354_v20  ;;  %v1961_v1 = vld [vmem:[%s2308_s26 + $0x7c8] sm:$0xff] }
 0x384   : > { %1461 = vst [vmem:[%s2688_s13 + $0x6d0] sm:$0xff] %v1205_v29  ;;  %v1236_v16 = vmul.f32 %v1961_v1, %v3354_v20  ;;  %v1962_v29 = vld [vmem:[%s2308_s26 + $0x7d0] sm:$0xff] }
 0x385   : > { %1462 = vst [vmem:[%s2688_s13 + $0x6d8] sm:$0xff] %v1206_v54  ;;  %v1237_v43 = vmul.f32 %v1962_v29, %v3354_v20  ;;  %v1963_v54 = vld [vmem:[%s2308_s26 + $0x7d8] sm:$0xff] }
 0x386   : > { %1463 = vst [vmem:[%s2688_s13 + $0x6e0] sm:$0xff] %v1207_v49  ;;  %v1238_v28 = vmul.f32 %v1963_v54, %v3354_v20  ;;  %v1964_v49 = vld [vmem:[%s2308_s26 + $0x7e0] sm:$0xff] }
 0x387   : > { %1464 = vst [vmem:[%s2688_s13 + $0x6e8] sm:$0xff] %v1208_v8  ;;  %v1239_v27 = vmul.f32 %v1964_v49, %v3354_v20  ;;  %v1965_v8 = vld [vmem:[%s2308_s26 + $0x7e8] sm:$0xff] }
 0x388   : > { %1465 = vst [vmem:[%s2688_s13 + $0x6f0] sm:$0xff] %v1209_v17  ;;  %v1240_v31 = vmul.f32 %v1965_v8, %v3354_v20  ;;  %v1966_v17 = vld [vmem:[%s2308_s26 + $0x7f0] sm:$0xff] }
 0x389   : > { %1466 = vst [vmem:[%s2688_s13 + $0x6f8] sm:$0xff] %v1210_v3  ;;  %v1241_v33 = vmul.f32 %v1966_v17, %v3354_v20  ;;  %v1967_v3 = vld [vmem:[%s2308_s26 + $0x7f8] sm:$0xff]  ;;  %s2108_s26 = scalar_lea.hbm %s3501_s5, 4096 }
 0x38a   : > { %1467 = vst [vmem:[%s2688_s13 + $0x700] sm:$0xff] %v1211_v39  ;;  %v1242_v35 = vmul.f32 %v1967_v3, %v3354_v20  ;;  %p2110_p10 = scmp.lt.s32.totalorder %s2108_s26, %s2104_s30 }
 0x38b   : > { %1468 = vst [vmem:[%s2688_s13 + $0x708] sm:$0xff] %v1212_v60 }
 0x38c   : > { %1469 = vst [vmem:[%s2688_s13 + $0x710] sm:$0xff] %v1213_v30  ;;  %p2111_p2 = por %p2110_p10, %p2109_p9 }
 0x38d   : > { %1470 = vst [vmem:[%s2688_s13 + $0x718] sm:$0xff] %v1214_v42 }
 0x38e   : > { %1471 = vst [vmem:[%s2688_s13 + $0x720] sm:$0xff] %v1215_v45  ;;  %p2112_p11 = pnand %p2111_p2, %p2107_p8 }
 0x38f   : > { %1472 = vst [vmem:[%s2688_s13 + $0x728] sm:$0xff] %v1216_v47 }
 0x390   : > { %1473 = vst [vmem:[%s2688_s13 + $0x730] sm:$0xff] %v1217_v50 }
 0x391   : > { %1474 = vst [vmem:[%s2688_s13 + $0x738] sm:$0xff] %v1218_v53 }
 0x392   : > { %1475 = vst [vmem:[%s2688_s13 + $0x740] sm:$0xff] %v1219_v55 }
 0x393   : > { %1476 = vst [vmem:[%s2688_s13 + $0x748] sm:$0xff] %v1220_v6 }
 0x394   : > { %1477 = vst [vmem:[%s2688_s13 + $0x750] sm:$0xff] %v1221_v14 }
 0x395   : > { %1478 = vst [vmem:[%s2688_s13 + $0x758] sm:$0xff] %v1222_v59 }
 0x396   : > { %1479 = vst [vmem:[%s2688_s13 + $0x760] sm:$0xff] %v1223_v62 }
 0x397   : > { %1480 = vst [vmem:[%s2688_s13 + $0x768] sm:$0xff] %v1224_v0 }
 0x398   : > { %1481 = vst [vmem:[%s2688_s13 + $0x770] sm:$0xff] %v1225_v4 }
 0x399   : > { %1482 = vst [vmem:[%s2688_s13 + $0x778] sm:$0xff] %v1226_v7 }
 0x39a   : > { %1483 = vst [vmem:[%s2688_s13 + $0x780] sm:$0xff] %v1227_v11 }
 0x39b   : > { %1484 = vst [vmem:[%s2688_s13 + $0x788] sm:$0xff] %v1228_v15 }
 0x39c   : > { %1485 = vst [vmem:[%s2688_s13 + $0x790] sm:$0xff] %v1229_v19 }
 0x39d   : > { %1486 = vst [vmem:[%s2688_s13 + $0x798] sm:$0xff] %v1230_v22 }
 0x39e   : > { %1487 = vst [vmem:[%s2688_s13 + $0x7a0] sm:$0xff] %v1231_v24 }
 0x39f   : > { %1488 = vst [vmem:[%s2688_s13 + $0x7a8] sm:$0xff] %v1232_v40 }
 0x3a0   : > { %1489 = vst [vmem:[%s2688_s13 + $0x7b0] sm:$0xff] %v1233_v10 }
 0x3a1   : > { %1490 = vst [vmem:[%s2688_s13 + $0x7b8] sm:$0xff] %v1234_v38 }
 0x3a2   : > { %1491 = vst [vmem:[%s2688_s13 + $0x7c0] sm:$0xff] %v1235_v26 }
 0x3a3   : > { %1492 = vst [vmem:[%s2688_s13 + $0x7c8] sm:$0xff] %v1236_v16 }
 0x3a4   : > { %1493 = vst [vmem:[%s2688_s13 + $0x7d0] sm:$0xff] %v1237_v43 }
 0x3a5   : > { %1494 = vst [vmem:[%s2688_s13 + $0x7d8] sm:$0xff] %v1238_v28 }
 0x3a6   : > { %1495 = vst [vmem:[%s2688_s13 + $0x7e0] sm:$0xff] %v1239_v27 }
 0x3a7   : > { %1496 = vst [vmem:[%s2688_s13 + $0x7e8] sm:$0xff] %v1240_v31 }
 0x3a8   : > { %1497 = vst [vmem:[%s2688_s13 + $0x7f0] sm:$0xff] %v1241_v33 }
 0x3a9   : > { %1498 = vst [vmem:[%s2688_s13 + $0x7f8] sm:$0xff] %v1242_v35 }
 0x3aa   : > { %2115 = shalt.err (!%p2112_p11)
}
 0x3ab   : > { %s2169_s12 = smov 4096   ;;  %s2170_s11 = smov 256  }
 0x3ac   : > { %1656 = dma.vmem_to_hbm [thread:$0]  (%p2274_p7), %s1513_s6, 32768, %s1515_s7, %s1500_s8, %s2169_s12, %s2169_s12, %s2170_s11  }
 0x3ad PF: > { %s1529_s13 = sand.u32 1, %s2150_s18   ;;  %p3507_p12 = scmp.ge.s32.totalorder %s2162_s21, 2 }
 0x3ae   : > { %s1530_s16 = scalar_lea.sflag [#allocation4], %s1529_s13 }
 0x3af   : > { %p1673_p13 = pnand %p3507_p12, %p2236_p6 }
 0x3b1   : > { %p1674_p0 = pneg %p1673_p13 }
 0x3b3   : > { %2145 = dma.done.wait (%p1674_p0), %s1530_s16, 32768  }
 0x3b4   : > { %2147 = vsyncadd (%p1674_p0), %s1530_s16, 4294934528  ;;  %p20_p3 = scmp.ge.s32.totalorder %s2260_s17, 4   ;;  %s3508_s18 = smov %s2154_s19 }
 0x3b5   : > { %s3509_s19 = smov %s2158_s20  ;;  %s3510_s20 = smov %s2270_s27 }
 0x3b6   : > { %s3511_s21 = smov %s2260_s17  ;;  %22 = sbr.rel (!%p20_p3) target bundleno = 7 (0x7), region = 97 }
 0x3bb   :  { %1536 = vsyncpa [#allocation3], 1 }
 0x3bc   :  { %1538 = vsyncpa [#allocation3 + $0x1], 1 }
 0x3bd   :  { %1539 = vsyncpa [#allocation6], 1 }
 0x3be   :  { %1540 = vsyncpa [#allocation9], 1 }
 0x3bf   :  { %1541 = vsyncpa [#allocation4], 1 }
 0x3c0   :  { %1543 = vsyncpa [#allocation4 + $0x1], 1 }

</bundles_post_ra>
